<compile_context>
chip_gen: v7x
topology: tpu7x:2x2x1
jax: 0.10.0
libtpu: 0.0.40
codegen_flags: <defaults>
</compile_context>

<pallas_src>
import functools

import jax
import jax.numpy as jnp
from jax.experimental import pallas as pl
from jax.experimental.pallas import tpu as pltpu


# ----------------------------------------------------------------------------
# Kernel
# ----------------------------------------------------------------------------

def _mha_kernel(x_ref, wq_ref, wk_ref, wv_ref, bq_ref, bk_ref, bv_ref,
                wp3_ref, bp_ref, o_ref, *, num_heads):
    # x_ref / o_ref: (1, N, C) -- one batch element per grid step.
    _, N, C = x_ref.shape
    hd = C // num_heads
    scale = float(hd) ** -0.5

    xb = x_ref[...].reshape(N, C).astype(jnp.bfloat16)

    # Q/K/V projections: bf16 MXU operands, f32 accumulation, f32 bias add.
    q = jnp.dot(xb, wq_ref[...], preferred_element_type=jnp.float32) + bq_ref[...]
    k = jnp.dot(xb, wk_ref[...], preferred_element_type=jnp.float32) + bk_ref[...]
    v = jnp.dot(xb, wv_ref[...], preferred_element_type=jnp.float32) + bv_ref[...]

    # Fold the softmax scale into q before the bf16 cast (cheaper than
    # scaling the (H, N, N) score tensor later).
    q = q * scale

    # (N, C) -> (H, N, hd): heads become the leading batch dim consumed by
    # the batched contractions below (layout-aware permute on the XLU).
    qh = pltpu.einshape("nhd->hnd", q.reshape(N, num_heads, hd)).astype(jnp.bfloat16)
    kh = pltpu.einshape("nhd->hnd", k.reshape(N, num_heads, hd)).astype(jnp.bfloat16)
    vh = pltpu.einshape("nhd->hnd", v.reshape(N, num_heads, hd)).astype(jnp.bfloat16)

    # All heads in one batched dot_general; K is consumed transposed by the
    # contraction itself (no explicit k.T).
    s = jnp.einsum("hqd,hkd->hqk", qh, kh,
                   preferred_element_type=jnp.float32)            # (H, N, N)

    # Numerically stable softmax in f32; reciprocal on the EUP.
    s = s - jnp.max(s, axis=-1, keepdims=True)
    p = jnp.exp(s)
    p = p * pl.reciprocal(jnp.sum(p, axis=-1, keepdims=True), approx=True)

    # Attention-weighted values, all heads in one batched contraction.
    ctx = jnp.einsum("hqk,hkd->hqd", p.astype(jnp.bfloat16), vh,
                     preferred_element_type=jnp.float32)          # (H, N, hd)

    # Output projection with the head-merge fused in:
    #   out = sum_h ctx_h @ Wp[h*hd:(h+1)*hd, :]
    # wp3_ref arrives pre-reshaped as (H, hd, C), so no 'hnd->nhd' transpose
    # or (N, H, hd) -> (N, C) reshape is needed here.
    out_h = jnp.einsum("hnd,hdc->hnc", ctx.astype(jnp.bfloat16), wp3_ref[...],
                       preferred_element_type=jnp.float32)        # (H, N, C)
    out = jnp.sum(out_h, axis=0) + bp_ref[...]                    # (N, C) f32
    o_ref[...] = out.reshape(1, N, C)


# ----------------------------------------------------------------------------
# Wrapper
# ----------------------------------------------------------------------------

def pack_params(params, num_heads):
    """One-time conversion of f32 master params to kernel-ready form:
    bf16 weights (half the DMA bytes), Wp pre-reshaped to (H, hd, C).
    Do this once at init -- NOT per call."""
    C = params["wq"].shape[0]
    hd = C // num_heads
    return {
        "wq": params["wq"].astype(jnp.bfloat16),
        "wk": params["wk"].astype(jnp.bfloat16),
        "wv": params["wv"].astype(jnp.bfloat16),
        "wp3": params["wp"].astype(jnp.bfloat16).reshape(num_heads, hd, C),
        "bq": params["bq"],
        "bk": params["bk"],
        "bv": params["bv"],
        "bp": params["bp"],
    }


def multi_head_attention(x, kparams, num_heads):
    """x: (B, N, C) f32, kparams from pack_params.  Returns (B, N, C) f32."""
    B, N, C = x.shape
    assert C % num_heads == 0, "embed_dim must be divisible by num_heads"

    weights = (kparams["wq"], kparams["wk"], kparams["wv"],
               kparams["bq"], kparams["bk"], kparams["bv"],
               kparams["wp3"], kparams["bp"])

    x_spec = pl.BlockSpec((1, N, C), lambda b: (b, 0, 0))

    def const_spec(a):
        nd = a.ndim
        # Constant block index across the grid: Pallas keeps the block
        # resident and skips the re-DMA on revisits.  (Weights are tiny at
        # C=128; single-buffering them only matters at large embed dims.)
        return pl.BlockSpec(a.shape, lambda b, _n=nd: (0,) * _n)

    kernel = functools.partial(_mha_kernel, num_heads=num_heads)

    return pl.pallas_call(
        kernel,
        out_shape=jax.ShapeDtypeStruct((B, N, C), jnp.float32),
        grid=(B,),
        in_specs=[x_spec] + [const_spec(w) for w in weights],
        out_specs=x_spec,
        compiler_params=pltpu.CompilerParams(
            dimension_semantics=("parallel",)),
    )(x, *weights)


# ----------------------------------------------------------------------------
# Plain-JAX fp32 reference (matches the PyTorch module's math)
# ----------------------------------------------------------------------------

def mha_reference(x, p, num_heads):
    B, N, C = x.shape
    hd = C // num_heads

    q = x @ p["wq"] + p["bq"]
    k = x @ p["wk"] + p["bk"]
    v = x @ p["wv"] + p["bv"]

    def split(t):
        return t.reshape(B, N, num_heads, hd).transpose(0, 2, 1, 3)

    q, k, v = split(q), split(k), split(v)
    s = jnp.einsum("bhqd,bhkd->bhqk", q, k) * (hd ** -0.5)
    a = jax.nn.softmax(s, axis=-1)
    o = jnp.einsum("bhqk,bhkd->bhqd", a, v)
    o = o.transpose(0, 2, 1, 3).reshape(B, N, C)
    return o @ p["wp"] + p["bp"]


# ----------------------------------------------------------------------------
# Parameters (deterministic, JAX convention: y = x @ W + b)
# ----------------------------------------------------------------------------

def init_params(key, embed_dim, std=0.02):
    ks = jax.random.split(key, 8)

    def nrm(k, shape):
        return jax.random.normal(k, shape, jnp.float32) * std

    return {
        "wq": nrm(ks[0], (embed_dim, embed_dim)),
        "wk": nrm(ks[1], (embed_dim, embed_dim)),
        "wv": nrm(ks[2], (embed_dim, embed_dim)),
        "bq": nrm(ks[3], (1, embed_dim)),
        "bk": nrm(ks[4], (1, embed_dim)),
        "bv": nrm(ks[5], (1, embed_dim)),
        "wp": nrm(ks[6], (embed_dim, embed_dim)),
        "bp": nrm(ks[7], (1, embed_dim)),
    }


# ----------------------------------------------------------------------------
# Main
# ----------------------------------------------------------------------------

if __name__ == "__main__":
    batch = 2
    seq_len = 16
    embed_dim = 128          # multiple of 128 -> lane-dense stores
    num_heads = 4            # head_dim = 32

    key = jax.random.PRNGKey(0)
    k_x, k_p = jax.random.split(key)

    x = jax.random.normal(k_x, (batch, seq_len, embed_dim), jnp.float32)
    params = init_params(k_p, embed_dim)
    kparams = pack_params(params, num_heads)   # bf16 / pre-reshaped, once

    out = multi_head_attention(x, kparams, num_heads)
    out = jax.block_until_ready(out)

    assert out.shape == (batch, seq_len, embed_dim), out.shape
    assert bool(jnp.all(jnp.isfinite(out)))

    # Tolerance gate for the bf16 matmul inputs (f32 accumulation).
    ref = mha_reference(x, params, num_heads)
    assert bool(jnp.allclose(out, ref, atol=1e-2, rtol=1e-2)), (
        float(jnp.max(jnp.abs(out - ref))))

    print("KERNEL_OK")
</pallas_src>

<mosaic_0001>
module attributes {stable_mosaic.version = 11 : i64} {
  func.func @_mha_kernel(%arg0: i32, %arg1: memref<1x16x128xf32, #tpu.memory_space<vmem>>, %arg2: memref<128x128xbf16, #tpu.memory_space<vmem>>, %arg3: memref<128x128xbf16, #tpu.memory_space<vmem>>, %arg4: memref<128x128xbf16, #tpu.memory_space<vmem>>, %arg5: memref<1x128xf32, #tpu.memory_space<vmem>>, %arg6: memref<1x128xf32, #tpu.memory_space<vmem>>, %arg7: memref<1x128xf32, #tpu.memory_space<vmem>>, %arg8: memref<4x32x128xbf16, #tpu.memory_space<vmem>>, %arg9: memref<1x128xf32, #tpu.memory_space<vmem>>, %arg10: memref<1x16x128xf32, #tpu.memory_space<vmem>>) attributes {dimension_semantics = [#tpu.dimension_semantics<parallel>], iteration_bounds = array<i64: 2>, scalar_prefetch = 0 : i64, scratch_operands = 0 : i64, tpu.core_type = #tpu.core_type<tc>, window_params = [{transform_indices = @transform_0, window_bounds = array<i64: 1, 16, 128>}, {pipeline_mode = #tpu.pipeline_mode<synchronous>, transform_indices = @transform_1, window_bounds = array<i64: 128, 128>}, {pipeline_mode = #tpu.pipeline_mode<synchronous>, transform_indices = @transform_2, window_bounds = array<i64: 128, 128>}, {pipeline_mode = #tpu.pipeline_mode<synchronous>, transform_indices = @transform_3, window_bounds = array<i64: 128, 128>}, {pipeline_mode = #tpu.pipeline_mode<synchronous>, transform_indices = @transform_4, window_bounds = array<i64: 1, 128>}, {pipeline_mode = #tpu.pipeline_mode<synchronous>, transform_indices = @transform_5, window_bounds = array<i64: 1, 128>}, {pipeline_mode = #tpu.pipeline_mode<synchronous>, transform_indices = @transform_6, window_bounds = array<i64: 1, 128>}, {pipeline_mode = #tpu.pipeline_mode<synchronous>, transform_indices = @transform_7, window_bounds = array<i64: 4, 32, 128>}, {pipeline_mode = #tpu.pipeline_mode<synchronous>, transform_indices = @transform_8, window_bounds = array<i64: 1, 128>}, {transform_indices = @transform_9, window_bounds = array<i64: 1, 16, 128>}]} {
    %c0 = arith.constant 0 : index
    %c0_0 = arith.constant 0 : index
    %c0_1 = arith.constant 0 : index
    %0 = vector.load %arg1[%c0, %c0_0, %c0_1] : memref<1x16x128xf32, #tpu.memory_space<vmem>>, vector<1x16x128xf32>
    %1 = vector.shape_cast %0 : vector<1x16x128xf32> to vector<16x128xf32>
    %2 = arith.truncf %1 : vector<16x128xf32> to vector<16x128xbf16>
    %c0_2 = arith.constant 0 : index
    %c0_3 = arith.constant 0 : index
    %3 = vector.load %arg2[%c0_2, %c0_3] : memref<128x128xbf16, #tpu.memory_space<vmem>>, vector<128x128xbf16>
    %cst = arith.constant dense<0.000000e+00> : vector<16x128xf32>
    %4 = tpu.matmul %2, %3, %cst {dimension_numbers = #tpu.dot_dimension_numbers<[1], [0], [0], [1], [0, 0, 1, 1], [], []>} : vector<16x128xbf16>, vector<128x128xbf16>, vector<16x128xf32> -> vector<16x128xf32>
    %c0_4 = arith.constant 0 : index
    %c0_5 = arith.constant 0 : index
    %5 = vector.load %arg5[%c0_4, %c0_5] : memref<1x128xf32, #tpu.memory_space<vmem>>, vector<1x128xf32>
    %6 = vector.broadcast %5 : vector<1x128xf32> to vector<16x128xf32>
    %7 = arith.addf %4, %6 : vector<16x128xf32>
    %c0_6 = arith.constant 0 : index
    %c0_7 = arith.constant 0 : index
    %8 = vector.load %arg3[%c0_6, %c0_7] : memref<128x128xbf16, #tpu.memory_space<vmem>>, vector<128x128xbf16>
    %cst_8 = arith.constant dense<0.000000e+00> : vector<16x128xf32>
    %9 = tpu.matmul %2, %8, %cst_8 {dimension_numbers = #tpu.dot_dimension_numbers<[1], [0], [0], [1], [0, 0, 1, 1], [], []>} : vector<16x128xbf16>, vector<128x128xbf16>, vector<16x128xf32> -> vector<16x128xf32>
    %c0_9 = arith.constant 0 : index
    %c0_10 = arith.constant 0 : index
    %10 = vector.load %arg6[%c0_9, %c0_10] : memref<1x128xf32, #tpu.memory_space<vmem>>, vector<1x128xf32>
    %11 = vector.broadcast %10 : vector<1x128xf32> to vector<16x128xf32>
    %12 = arith.addf %9, %11 : vector<16x128xf32>
    %c0_11 = arith.constant 0 : index
    %c0_12 = arith.constant 0 : index
    %13 = vector.load %arg4[%c0_11, %c0_12] : memref<128x128xbf16, #tpu.memory_space<vmem>>, vector<128x128xbf16>
    %cst_13 = arith.constant dense<0.000000e+00> : vector<16x128xf32>
    %14 = tpu.matmul %2, %13, %cst_13 {dimension_numbers = #tpu.dot_dimension_numbers<[1], [0], [0], [1], [0, 0, 1, 1], [], []>} : vector<16x128xbf16>, vector<128x128xbf16>, vector<16x128xf32> -> vector<16x128xf32>
    %c0_14 = arith.constant 0 : index
    %c0_15 = arith.constant 0 : index
    %15 = vector.load %arg7[%c0_14, %c0_15] : memref<1x128xf32, #tpu.memory_space<vmem>>, vector<1x128xf32>
    %16 = vector.broadcast %15 : vector<1x128xf32> to vector<16x128xf32>
    %17 = arith.addf %14, %16 : vector<16x128xf32>
    %cst_16 = arith.constant 0.176776692 : f32
    %18 = vector.broadcast %cst_16 : f32 to vector<16x128xf32>
    %19 = arith.mulf %7, %18 : vector<16x128xf32>
    %20 = vector.shape_cast %19 : vector<16x128xf32> to vector<16x4x32xf32>
    %21 = tpu.transpose %20, [1, 0, 2] : vector<16x4x32xf32> -> vector<4x16x32xf32>
    %22 = arith.truncf %21 : vector<4x16x32xf32> to vector<4x16x32xbf16>
    %23 = vector.shape_cast %12 : vector<16x128xf32> to vector<16x4x32xf32>
    %24 = tpu.transpose %23, [1, 0, 2] : vector<16x4x32xf32> -> vector<4x16x32xf32>
    %25 = arith.truncf %24 : vector<4x16x32xf32> to vector<4x16x32xbf16>
    %26 = vector.shape_cast %17 : vector<16x128xf32> to vector<16x4x32xf32>
    %27 = tpu.transpose %26, [1, 0, 2] : vector<16x4x32xf32> -> vector<4x16x32xf32>
    %28 = arith.truncf %27 : vector<4x16x32xf32> to vector<4x16x32xbf16>
    "tpu.trace_start"() <{level = 10 : i32, message = "hqd,hkd->hqk"}> : () -> ()
    %cst_17 = arith.constant dense<0.000000e+00> : vector<4x16x16xf32>
    %29 = tpu.matmul %22, %25, %cst_17 {dimension_numbers = #tpu.dot_dimension_numbers<[2], [2], [1], [1], [0, 0, 0, 1, 1, 1], [0], [0]>} : vector<4x16x32xbf16>, vector<4x16x32xbf16>, vector<4x16x16xf32> -> vector<4x16x16xf32>
    "tpu.trace_stop"() : () -> ()
    %cst_18 = arith.constant dense<0xFF800000> : vector<4x16xf32>
    %30 = vector.multi_reduction <maximumf>, %29, %cst_18 [2] : vector<4x16x16xf32> to vector<4x16xf32>
    %31 = vector.shape_cast %30 : vector<4x16xf32> to vector<4x16x1xf32>
    %32 = vector.broadcast %31 : vector<4x16x1xf32> to vector<4x16x16xf32>
    %33 = arith.subf %29, %32 : vector<4x16x16xf32>
    %34 = math.exp %33 : vector<4x16x16xf32>
    %cst_19 = arith.constant dense<0.000000e+00> : vector<4x16xf32>
    %35 = vector.multi_reduction <add>, %34, %cst_19 [2] : vector<4x16x16xf32> to vector<4x16xf32>
    %36 = vector.shape_cast %35 : vector<4x16xf32> to vector<4x16x1xf32>
    %37 = tpu.reciprocal %36 {approx = true} : vector<4x16x1xf32> -> vector<4x16x1xf32>
    %38 = vector.broadcast %37 : vector<4x16x1xf32> to vector<4x16x16xf32>
    %39 = arith.mulf %34, %38 : vector<4x16x16xf32>
    %40 = arith.truncf %39 : vector<4x16x16xf32> to vector<4x16x16xbf16>
    "tpu.trace_start"() <{level = 10 : i32, message = "hqk,hkd->hqd"}> : () -> ()
    %cst_20 = arith.constant dense<0.000000e+00> : vector<4x16x32xf32>
    %41 = tpu.matmul %40, %28, %cst_20 {dimension_numbers = #tpu.dot_dimension_numbers<[2], [1], [1], [2], [0, 0, 0, 1, 1, 2], [0], [0]>} : vector<4x16x16xbf16>, vector<4x16x32xbf16>, vector<4x16x32xf32> -> vector<4x16x32xf32>
    "tpu.trace_stop"() : () -> ()
    %42 = arith.truncf %41 : vector<4x16x32xf32> to vector<4x16x32xbf16>
    %c0_21 = arith.constant 0 : index
    %c0_22 = arith.constant 0 : index
    %c0_23 = arith.constant 0 : index
    %43 = vector.load %arg8[%c0_21, %c0_22, %c0_23] : memref<4x32x128xbf16, #tpu.memory_space<vmem>>, vector<4x32x128xbf16>
    "tpu.trace_start"() <{level = 10 : i32, message = "hnd,hdc->hnc"}> : () -> ()
    %cst_24 = arith.constant dense<0.000000e+00> : vector<4x16x128xf32>
    %44 = tpu.matmul %42, %43, %cst_24 {dimension_numbers = #tpu.dot_dimension_numbers<[2], [1], [1], [2], [0, 0, 0, 1, 1, 2], [0], [0]>} : vector<4x16x32xbf16>, vector<4x32x128xbf16>, vector<4x16x128xf32> -> vector<4x16x128xf32>
    "tpu.trace_stop"() : () -> ()
    %cst_25 = arith.constant dense<0.000000e+00> : vector<16x128xf32>
    %45 = vector.multi_reduction <add>, %44, %cst_25 [0] : vector<4x16x128xf32> to vector<16x128xf32>
    %c0_26 = arith.constant 0 : index
    %c0_27 = arith.constant 0 : index
    %46 = vector.load %arg9[%c0_26, %c0_27] : memref<1x128xf32, #tpu.memory_space<vmem>>, vector<1x128xf32>
    %47 = vector.broadcast %46 : vector<1x128xf32> to vector<16x128xf32>
    %48 = arith.addf %45, %47 : vector<16x128xf32>
    %49 = vector.shape_cast %48 : vector<16x128xf32> to vector<1x16x128xf32>
    %c0_28 = arith.constant 0 : index
    %c0_29 = arith.constant 0 : index
    %c0_30 = arith.constant 0 : index
    %50 = vector.load %arg10[%c0_28, %c0_29, %c0_30] : memref<1x16x128xf32, #tpu.memory_space<vmem>>, vector<1x16x128xf32>
    tpu.vector_store %arg10[%c0_28, %c0_29, %c0_30], %49 {strides = array<i32>} : memref<1x16x128xf32, #tpu.memory_space<vmem>>, vector<1x16x128xf32>,
    return
  }
  func.func @transform_0(%arg0: i32) -> (i32, i32, i32) {
    %c0_i32 = arith.constant 0 : i32
    %c0_i32_0 = arith.constant 0 : i32
    %c0_i32_1 = arith.constant 0 : i32
    return %arg0, %c0_i32, %c0_i32_0 : i32, i32, i32
  }
  func.func @transform_1(%arg0: i32) -> (i32, i32) {
    %c0_i32 = arith.constant 0 : i32
    %c0_i32_0 = arith.constant 0 : i32
    %c0_i32_1 = arith.constant 0 : i32
    return %c0_i32, %c0_i32_0 : i32, i32
  }
  func.func @transform_2(%arg0: i32) -> (i32, i32) {
    %c0_i32 = arith.constant 0 : i32
    %c0_i32_0 = arith.constant 0 : i32
    %c0_i32_1 = arith.constant 0 : i32
    return %c0_i32, %c0_i32_0 : i32, i32
  }
  func.func @transform_3(%arg0: i32) -> (i32, i32) {
    %c0_i32 = arith.constant 0 : i32
    %c0_i32_0 = arith.constant 0 : i32
    %c0_i32_1 = arith.constant 0 : i32
    return %c0_i32, %c0_i32_0 : i32, i32
  }
  func.func @transform_4(%arg0: i32) -> (i32, i32) {
    %c0_i32 = arith.constant 0 : i32
    %c0_i32_0 = arith.constant 0 : i32
    %c0_i32_1 = arith.constant 0 : i32
    return %c0_i32, %c0_i32_0 : i32, i32
  }
  func.func @transform_5(%arg0: i32) -> (i32, i32) {
    %c0_i32 = arith.constant 0 : i32
    %c0_i32_0 = arith.constant 0 : i32
    %c0_i32_1 = arith.constant 0 : i32
    return %c0_i32, %c0_i32_0 : i32, i32
  }
  func.func @transform_6(%arg0: i32) -> (i32, i32) {
    %c0_i32 = arith.constant 0 : i32
    %c0_i32_0 = arith.constant 0 : i32
    %c0_i32_1 = arith.constant 0 : i32
    return %c0_i32, %c0_i32_0 : i32, i32
  }
  func.func @transform_7(%arg0: i32) -> (i32, i32, i32) {
    %c0_i32 = arith.constant 0 : i32
    %c0_i32_0 = arith.constant 0 : i32
    %c0_i32_1 = arith.constant 0 : i32
    %c0_i32_2 = arith.constant 0 : i32
    return %c0_i32, %c0_i32_0, %c0_i32_1 : i32, i32, i32
  }
  func.func @transform_8(%arg0: i32) -> (i32, i32) {
    %c0_i32 = arith.constant 0 : i32
    %c0_i32_0 = arith.constant 0 : i32
    %c0_i32_1 = arith.constant 0 : i32
    return %c0_i32, %c0_i32_0 : i32, i32
  }
  func.func @transform_9(%arg0: i32) -> (i32, i32, i32) {
    %c0_i32 = arith.constant 0 : i32
    %c0_i32_0 = arith.constant 0 : i32
    %c0_i32_1 = arith.constant 0 : i32
    return %arg0, %c0_i32, %c0_i32_0 : i32, i32, i32
  }
}

</mosaic_0001>

<bundles_post_ra>
// kernel: tpu_custom_call.1
= control target key start
LH: loop header
LB: loop body
LE: loop exit
PB: predicated region body
PF: predicated region fallthrough
CT: control target
= control target key end

     0   :  { %s3864_s0 = inlined_call_operand.hbm [shape: f32[2,16,128], index: 0, kind: input, shape index: {}]   ;;  %s3865_s1 = inlined_call_operand.hbm [shape: bf16[128,128], index: 1, kind: input, shape index: {}]   ;;  %s3866_s2 = inlined_call_operand.hbm [shape: bf16[128,128], index: 2, kind: input, shape index: {}]   ;;  %s3867_s3 = inlined_call_operand.hbm [shape: bf16[128,128], index: 3, kind: input, shape index: {}]   ;;  %s3868_s4 = inlined_call_operand.vmem [shape: f32[1,128], index: 4, kind: input, shape index: {}]   ;;  %s3869_s5 = inlined_call_operand.vmem [shape: f32[1,128], index: 5, kind: input, shape index: {}]   ;;  %s3870_s6 = inlined_call_operand.vmem [shape: f32[1,128], index: 6, kind: input, shape index: {}]   ;;  %s3871_s7 = inlined_call_operand.hbm [shape: bf16[4,32,128], index: 7, kind: input, shape index: {}]   ;;  %s3872_s8 = inlined_call_operand.vmem [shape: f32[1,128], index: 8, kind: input, shape index: {}]   ;;  %s3873_s9 = inlined_call_operand.hbm [shape: f32[2,16,128], index: 9, kind: output, shape index: {}]  }
   0x1   :  { %3880 = sst [smem:[#allocation18_spill]] %s3873_s9 }
   0x2   :  { %14 = vsyncpa [#allocation3], 0 }
   0x3   :  { %16 = vsyncpa [#allocation3 + $0x1], 0 }
   0x4   :  { %17 = vsyncpa [#allocation6], 0 }
   0x5   :  { %18 = vsyncpa [#allocation9], 0 }
   0x6   :  { %19 = vsyncpa [#allocation4], 0 }
   0x7   :  { %21 = vsyncpa [#allocation4 + $0x1], 0  ;;  %s3213_s30 = smov 0   ;;  %s3215_s10 = smov 0  }
   0x8   :  { %s3217_s11 = smov 0   ;;  %s3219_s12 = smov 0  }
   0x9 LB: > { %3881 = sst [smem:[#allocation16_spill]] %s3130_s30  ;;  %s3234_s13 = sadd.s32 4294967295, %s3142_s12   ;;  %s3142_s12 = sphi %s3219_s12, %s3905_s12   ;;  %s3138_s11 = sphi %s3217_s11, %s3904_s11   ;;  %s3134_s10 = sphi %s3215_s10, %s3903_s10   ;;  %s3130_s30 = sphi %s3213_s30, %s3902_s30  }
   0xa   : > { %s2483_s14 = sadd.s32 4294967294, %s3142_s12   ;;  %p47_p0 = scmp.ne.s32.totalorder %s3134_s10, %s3130_s30 }
   0xb   : > { %p3874_p1 = scmp.eq.s32.totalorder %s3234_s13, 0  ;;  %p245_p3 = scmp.eq.s32.totalorder %s2483_s14, 1 }
   0xc   : > { %p2484_p5 = scmp.ge.s32.totalorder %s3142_s12, 1  ;;  %p252_p7 = scmp.lt.s32.totalorder %s3142_s12, 3 }
   0xd   : > { %p3243_p4 = por %p3874_p1, %p47_p0  ;;  %p3248_p6 = por %p245_p3, %p47_p0 }
   0xe   : > { %p3253_p8 = pnand %p2484_p5, %p252_p7  ;;  %s3144_s18 = smov [#allocation5]  }
   0xf   : > { %s3882_s15 = scalar_select %p3243_p4, 1, 0 }
  0x10   : > { %s3883_s16 = scalar_select %p3248_p6, 1, 0 }
  0x11   : > { %s3885_s17 = scalar_select %p3253_p8, 1, 0 }
  0x12   : > { %3884 = sst [smem:[#allocation17_spill]] %s3883_s16  ;;  %s264_s19 = sshll.u32 %s3144_s18, 4  ;;  %s3257_s19 = int_to_ptr.vmem [resolvable:$true] %s264_s19 }
  0x13   : > { %p2782_p9 = pneg %p3253_p8  ;;  %s3145_s21 = smov [#allocation8]  }
  0x14   : > { %s290_s22 = sshll.u32 %s3145_s21, 4  ;;  %s3146_s23 = smov [#allocation7]   ;;  %s3268_s22 = int_to_ptr.vmem [resolvable:$true] %s290_s22 }
  0x15   : > { %p3264_p11 = pnand %p2782_p9, %p3874_p1  ;;  %s3270_s24 = sshll.u32 %s3146_s23, 4  ;;  %s278_s24 = int_to_ptr.vmem [resolvable:$true] %s3270_s24 }
  0x16   : > { %s2926_s27 = scalar_lea.hbm %s3865_s1, 1024 }
  0x17   : > { %p2927_p12 = scmp.ne.s32.totalorder %s3865_s1, %s2926_s27  ;;  %p3280_p13 = pneg %p3264_p11 }
  0x18   : > { %p2933_p5 = scmp.lt.u32.totalorder %s2926_s27, %s3865_s1 }
  0x19   : > { %p2929_p0 = pnand %p3280_p13, %p2927_p12 }
  0x1b   : > { %p2930_p3 = pneg %p2929_p0 }
  0x1d   : > { %p2935_p7 = pnand %p2933_p5, %p2930_p3 }
  0x1f   : > { %2938 = shalt.err (!%p2935_p7)
}
  0x20   : > { %s2939_s23 = scalar_lea.vmem %s3257_s19, 1024  ;;  %p2947_p2 = scmp.lt.s32.totalorder %s3257_s19, %s3257_s19 }
  0x21   : > { %p2940_p9 = scmp.ne.s32.totalorder %s3257_s19, %s2939_s23  ;;  %p2948_p6 = scmp.lt.s32.totalorder %s2939_s23, %s2939_s23 }
  0x23   : > { %p2942_p10 = pnand %p2940_p9, %p3280_p13  ;;  %p2949_p12 = por %p2948_p6, %p2947_p2 }
  0x25   : > { %p2943_p1 = pneg %p2942_p10 }
  0x27   : > { %p2950_p0 = pnand %p2949_p12, %p2943_p1 }
  0x29   : > { %2953 = shalt.err (!%p2950_p0)
}
  0x2a   : > { %s3147_s25 = smov 64   ;;  %s3148_s26 = smov 4  }
  0x2b   : > { %2785 = dma.hbm_to_vmem [thread:$0]  (!%p3264_p11), %s3865_s1, 1024, %s3257_s19, [#allocation6], %s3147_s25, %s3147_s25, %s3148_s26  }
  0x2c   : > { %s2954_s21 = scalar_lea.hbm %s3867_s3, 1024 }
  0x2d   : > { %p2955_p1 = scmp.ne.s32.totalorder %s3867_s3, %s2954_s21  ;;  %p2961_p10 = scmp.lt.u32.totalorder %s2954_s21, %s3867_s3 }
  0x2f   : > { %p2957_p2 = pnand %p2955_p1, %p3280_p13 }
  0x31   : > { %p2958_p6 = pneg %p2957_p2 }
  0x33   : > { %p2963_p3 = pnand %p2961_p10, %p2958_p6 }
  0x35   : > { %2966 = shalt.err (!%p2963_p3)
}
  0x36   : > { %s2967_s19 = scalar_lea.vmem %s3268_s22, 1024  ;;  %p2975_p12 = scmp.lt.s32.totalorder %s3268_s22, %s3268_s22 }
  0x37   : > { %p2968_p5 = scmp.ne.s32.totalorder %s3268_s22, %s2967_s19  ;;  %p2976_p0 = scmp.lt.s32.totalorder %s2967_s19, %s2967_s19 }
  0x39   : > { %p2970_p7 = pnand %p2968_p5, %p3280_p13  ;;  %p2977_p1 = por %p2976_p0, %p2975_p12 }
  0x3b   : > { %p2971_p9 = pneg %p2970_p7 }
  0x3d   : > { %p2978_p2 = pnand %p2977_p1, %p2971_p9 }
  0x3f   : > { %2981 = shalt.err (!%p2978_p2)
}
  0x40   : > { %2791 = dma.hbm_to_vmem [thread:$0]  (!%p3264_p11), %s3867_s3, 1024, %s3268_s22, [#allocation9], %s3147_s25, %s3147_s25, %s3148_s26  }
  0x41   : > { %s2982_s28 = scalar_lea.hbm %s3866_s2, 1024 }
  0x42   : > { %p2983_p6 = scmp.ne.s32.totalorder %s3866_s2, %s2982_s28  ;;  %p2989_p5 = scmp.lt.u32.totalorder %s2982_s28, %s3866_s2 }
  0x44   : > { %p2985_p10 = pnand %p2983_p6, %p3280_p13 }
  0x46   : > { %p2986_p3 = pneg %p2985_p10 }
  0x48   : > { %p2991_p7 = pnand %p2989_p5, %p2986_p3 }
  0x4a   : > { %2994 = shalt.err (!%p2991_p7)
}
  0x4b   : > { %s2995_s19 = scalar_lea.vmem %s278_s24, 1024  ;;  %p3003_p1 = scmp.lt.s32.totalorder %s278_s24, %s278_s24 }
  0x4c   : > { %p2996_p9 = scmp.ne.s32.totalorder %s278_s24, %s2995_s19  ;;  %p3004_p2 = scmp.lt.s32.totalorder %s2995_s19, %s2995_s19 }
  0x4e   : > { %p2998_p12 = pnand %p2996_p9, %p3280_p13  ;;  %p3005_p4 = por %p3004_p2, %p3003_p1 }
  0x50   : > { %p2999_p0 = pneg %p2998_p12 }
  0x52   : > { %p3006_p8 = pnand %p3005_p4, %p2999_p0 }
  0x54   : > { %3009 = shalt.err (!%p3006_p8)
}
  0x55   : > { %2788 = dma.hbm_to_vmem [thread:$0]  (!%p3264_p11), %s3866_s2, 1024, %s278_s24, [#allocation6], %s3147_s25, %s3147_s25, %s3148_s26  }
  0x56   : > { %s3149_s30 = smov [#allocation10]   ;;  %s3010_s29 = scalar_lea.hbm %s3871_s7, 1024 }
  0x57   : > { %s312_s16 = sshll.u32 %s3149_s30, 4  ;;  %p3011_p4 = scmp.ne.s32.totalorder %s3871_s7, %s3010_s29  ;;  %s313_s16 = int_to_ptr.vmem [resolvable:$true] %s312_s16 }
  0x58   : > { %p3017_p10 = scmp.lt.u32.totalorder %s3010_s29, %s3871_s7 }
  0x59   : > { %p3013_p8 = pnand %p3011_p4, %p3280_p13 }
  0x5b   : > { %p3014_p6 = pneg %p3013_p8 }
  0x5d   : > { %p3019_p3 = pnand %p3017_p10, %p3014_p6 }
  0x5f   : > { %3022 = shalt.err (!%p3019_p3)
}
  0x60   : > { %s3023_s24 = scalar_lea.vmem %s313_s16, 1024  ;;  %p3031_p12 = scmp.lt.s32.totalorder %s313_s16, %s313_s16 }
  0x61   : > { %p3024_p5 = scmp.ne.s32.totalorder %s313_s16, %s3023_s24  ;;  %p3032_p0 = scmp.lt.s32.totalorder %s3023_s24, %s3023_s24 }
  0x63   : > { %p3026_p7 = pnand %p3024_p5, %p3280_p13  ;;  %p3033_p1 = por %p3032_p0, %p3031_p12 }
  0x65   : > { %p3027_p9 = pneg %p3026_p7 }
  0x67   : > { %p3034_p2 = pnand %p3033_p1, %p3027_p9 }
  0x69   : > { %3037 = shalt.err (!%p3034_p2)
}
  0x6a   : > { %2794 = dma.hbm_to_vmem [thread:$0]  (!%p3264_p11), %s3871_s7, 1024, %s313_s16, [#allocation9], %s3147_s25, %s3147_s25, %s3148_s26  }
  0x6b   : > { %s3374_s14 = sadd.s32 1, %s3142_s12   ;;  %s34_s20 = sadd.s32 1, %s3138_s11 }
  0x6c   : > { %s31_s30 = ssub.s32 %s3142_s12, %s3374_s14  ;;  %p41_p13 = scmp.ne.s32.totalorder %s3138_s11, %s3134_s10 }
  0x6d   : > { %p32_p4 = scmp.eq.s32.totalorder %s31_s30, 0  ;;  %p42_p8 = scmp.eq.s32.totalorder %s3142_s12, 0 }
  0x6e   : > { %p3888_p6 = scmp.eq.s32.totalorder %s3234_s13, 1  ;;  %p2807_p3 = scmp.lt.s32.totalorder %s3142_s12, 2 }
  0x6f   : > { %s3390_s28 = scalar_select %p32_p4, %s3138_s11, %s34_s20  }
  0x70   : > { %p3384_p10 = por %p3888_p6, %p41_p13  ;;  %p43_p5 = por %p42_p8, %p41_p13 }
  0x71   : > { %s329_s29 = sand.u32 1, %s3138_s11   ;;  %s2565_s25 = sshll.u32 %s3142_s12, 8 }
  0x72   : > { %s2490_s18 = sshll.u32 %s329_s29, 4  ;;  %s3397_s21 = scalar_lea.hbm %s3864_s0, %s2565_s25 }
  0x73   : > { %s333_s23 = scalar_lea.vmem [#allocation2], %s2490_s18  ;;  %p3401_p11 = pnand %p2807_p3, %p43_p5 }
  0x74   : > { %s340_s19 = sshll.u32 %s333_s23, 4  ;;  %s3405_s22 = scalar_lea.sflag [#allocation3], %s329_s29  ;;  %s3399_s19 = int_to_ptr.vmem [resolvable:$true] %s340_s19 }
  0x75   : > { %s3038_s9 = scalar_lea.hbm %s3397_s21, 256  ;;  %p3040_p9 = pneg %p3401_p11 }
  0x76   : > { %p3039_p7 = scmp.ne.s32.totalorder %s3397_s21, %s3038_s9  ;;  %s3043_s18 = scalar_lea.hbm %s3864_s0, 512 }
  0x77   : > { %p3044_p1 = scmp.lt.u32.totalorder %s3397_s21, %s3864_s0  ;;  %p3045_p2 = scmp.lt.u32.totalorder %s3043_s18, %s3038_s9 }
  0x78   : > { %p3041_p12 = pnand %p3040_p9, %p3039_p7  ;;  %p3047_p4 = scmp.lt.u32.totalorder %s3038_s9, %s3397_s21 }
  0x79   : > { %p3046_p13 = por %p3045_p2, %p3044_p1 }
  0x7a   : > { %p3042_p0 = pneg %p3041_p12 }
  0x7b   : > { %p3048_p8 = por %p3047_p4, %p3046_p13 }
  0x7d   : > { %p3049_p6 = pnand %p3048_p8, %p3042_p0 }
  0x7f   : > { %3052 = shalt.err (!%p3049_p6)
}
  0x80   : > { %s3053_s29 = scalar_lea.vmem %s3399_s19, 256  ;;  %s3150_s16 = smov [#allocation2]  }
  0x81   : > { %p3054_p3 = scmp.ne.s32.totalorder %s3399_s19, %s3053_s29  ;;  %s3058_s23 = sshll.u32 %s3150_s16, 4  ;;  %s3059_s23 = int_to_ptr.vmem [resolvable:$false] %s3058_s23 }
  0x82   : > { %s3060_s20 = scalar_lea.vmem %s3059_s23, 512  ;;  %p3061_p12 = scmp.lt.s32.totalorder %s3399_s19, %s3059_s23 }
  0x83   : > { %p3056_p5 = pnand %p3054_p3, %p3040_p9  ;;  %p3062_p1 = scmp.lt.s32.totalorder %s3060_s20, %s3053_s29 }
  0x85   : > { %p3057_p7 = pneg %p3056_p5  ;;  %p3063_p2 = por %p3062_p1, %p3061_p12 }
  0x87   : > { %p3064_p13 = pnand %p3063_p2, %p3057_p7 }
  0x89   : > { %3067 = shalt.err (!%p3064_p13)
}
  0x8a   : > { %s3151_s9 = smov 128   ;;  %s3152_s30 = smov 8  }
  0x8b   : > { %2798 = dma.hbm_to_vmem [thread:$0]  (!%p3401_p11), %s3397_s21, 256, %s3399_s19, %s3405_s22, %s3151_s9, %s3151_s9, %s3152_s30  }
  0x8c   : > { %p3891_p9 = scmp.ne.s32.totalorder %s3885_s17, 0 }
  0x8d   : > { %s3436_s18 = sand.u32 (!%p3891_p9), 1, %s3134_s10   ;;  %p3892_p0 = scmp.ne.s32.totalorder (!%p3891_p9), %s3882_s15, 0 }
  0x8e   : > { %352 = sbr.rel (%p3891_p9) target bundleno = 1606 (0x646), region = 56  ;;  %s2494_s25 = sshll.u32 (!%p3891_p9), %s3436_s18, 4 }
  0x8f   : > { %s355_s26 = scalar_lea.sflag (!%p3891_p9), [#allocation3], %s3436_s18  ;;  %s3442_s29 = scalar_lea.vmem (!%p3891_p9), [#allocation2], %s2494_s25 }
  0x95   : > { %3113 = dma.done.wait (%p3892_p0), %s355_s26, 256  }
  0x96   : > { %3115 = vsyncadd (%p3892_p0), %s355_s26, 4294967040  ;;  %p3893_p11 = scmp.eq.s32.totalorder %s3234_s13, 0 }
  0x98   : > { %3117 = dma.done.wait (%p3893_p11), [#allocation6], 2048   ;;  %p3894_p4 = pmov %p3893_p11 }
  0x9a   : > { %3119 = vsyncadd (%p3894_p4), [#allocation6], 4294965248  ;;  %p3895_p8 = pmov %p3894_p4 }
  0x9b   : > { %p3896_p6 = pmov %p3894_p4 }
  0x9c   : > { %3121 = dma.done.wait (%p3895_p8), [#allocation9], 2048  }
  0x9d   : > { %3123 = vsyncadd (%p3896_p6), [#allocation9], 4294965248  ;;  %v3153_v0 = vmov 0.0   ;;  %vm3154_vm0 = vmmov 0   ;;  %v2862_v1 = vld [vmem:[#allocation7] sm:$0xff]   ;;  %v2863_v2 = vld [vmem:[#allocation7 + $0x8] sm:$0xff]   ;;  %v776_v46 = vlaneseq }
  0x9e   : > { %2642 = vmatprep.subr.bf16.mxu1 %v3153_v0  ;;  %2622 = vmatprep.subr.bf16.mxu0 %v3153_v0  ;;  %v2864_v3 = vld [vmem:[#allocation5] sm:$0xff]   ;;  %v2866_v4 = vld [vmem:[#allocation5 + $0x8] sm:$0xff]   ;;  %v2865_v5 = vld [vmem:[#allocation7 + $0x10] sm:$0xff]   ;;  %s3155_s21 = smov 64   ;;  %s3156_s19 = smov 96   ;;  %vm1639_vm1 = vcmask 261120  }
  0x9f   : > { %2658 = vmatprep.mubr.msk.bf16.mxu1 %vm3154_vm0, %v3153_v0  ;;  %2638 = vmatprep.mubr.msk.bf16.mxu0 %vm3154_vm0, %v3153_v0  ;;  %v2868_v6 = vld [vmem:[#allocation5 + $0x10] sm:$0xff]   ;;  %v2867_v7 = vld [vmem:[#allocation7 + $0x18] sm:$0xff]   ;;  %v2869_v9 = vld [vmem:[#allocation7 + $0x20] sm:$0xff]   ;;  %s3157_s16 = smov 32   ;;  %v3158_v44 = vmov 1983009808  }
  0xa0   : > { %2643 = vmatpush3.bf16.msra.mxu1 %v2862_v1  ;;  %2623 = vmatpush3.bf16.msra.mxu0 %v2864_v3  ;;  %v2870_v8 = vld [vmem:[#allocation5 + $0x18] sm:$0xff]   ;;  %v2871_v10 = vld [vmem:[#allocation7 + $0x28] sm:$0xff]   ;;  %v2872_v11 = vld [vmem:[#allocation5 + $0x20] sm:$0xff]   ;;  %v774_v45 = vunpack.c.l.s4 %v3158_v44  ;;  %v3159_v47 = vmov 1934713408   ;;  %v777_v50 = vshrl.u32 %v776_v46, 7 }
  0xa1   : > { %2644 = vmatprep.subr.bf16.mxu1 %v3153_v0  ;;  %2624 = vmatprep.subr.bf16.mxu0 %v3153_v0  ;;  %v2874_v12 = vld [vmem:[#allocation5 + $0x28] sm:$0xff]   ;;  %v2873_v13 = vld [vmem:[#allocation7 + $0x30] sm:$0xff]   ;;  %v2875_v15 = vld [vmem:[#allocation7 + $0x38] sm:$0xff]   ;;  %v806_v48 = vunpack.c.l.s4 %v3159_v47  ;;  %vm1828_vm2 = vcmask 130048   ;;  %s408_s26 = scalar_lea.vmem [#allocation11], %s2494_s25  ;;  %s2566_s15 = sshll.u32 %s3234_s13, 8 }
  0xa2   : > { %v2876_v14 = vld [vmem:[#allocation5 + $0x30] sm:$0xff]   ;;  %v411_v17 = vld [vmem:[%s3442_s29 + $0x8] sm:$0xff]  ;;  %v2509_v20 = vld [vmem:[%s3869_s5] ss:$0 sm:$0xff]  ;;  %v775_v49 = vunpack.c.0.s8 %v774_v45  ;;  %s2359_s25 = scalar_lea.sflag [#allocation4], %s3436_s18  ;;  %s3160_s13 = smov [#allocation11]  }
  0xa3   : > { %v410_v16 = vld [vmem:[%s3442_s29] sm:$0xff]  ;;  %v2877_v18 = vld [vmem:[#allocation5 + $0x38] sm:$0xff]   ;;  %v2879_v37 = vld [vmem:[#allocation8 + $0x8] sm:$0xff]   ;;  %v807_v53 = vunpack.c.0.s8 %v806_v48  ;;  %s2372_s29 = sshll.u32 %s408_s26, 4  ;;  %s3815_s29 = int_to_ptr.vmem [resolvable:$true] %s2372_s29 }
  0xa4   : > { %2645 = vmatpush3.bf16.msra.mxu1 %v2863_v2  ;;  %2625 = vmatpush3.bf16.msra.mxu0 %v2866_v4  ;;  %v3477_v19 = vpack.c.bf16 %v411_v17, %v410_v16  ;;  %v2500_v31 = vld [vmem:[%s3868_s4] ss:$0 sm:$0xff]  ;;  %v2880_v38 = vld [vmem:[#allocation8 + $0x10] sm:$0xff]   ;;  %v2881_v39 = vld [vmem:[#allocation8 + $0x18] sm:$0xff]   ;;  %v3537_v54 = vsub.s32 %v775_v49, %v777_v50  ;;  %s3068_s22 = scalar_lea.vmem %s3815_s29, 256 }
  0xa5   : > { %2646 = vmatprep.subr.bf16.mxu1 %v3153_v0  ;;  %2626 = vmatprep.subr.bf16.mxu0 %v3153_v0  ;;  %v2878_v36 = vld [vmem:[#allocation8] sm:$0xff]   ;;  %v2883_v41 = vld [vmem:[#allocation8 + $0x28] sm:$0xff]   ;;  %v2884_v42 = vld [vmem:[#allocation8 + $0x30] sm:$0xff]   ;;  %v3541_v61 = vsub.s32 %v807_v53, %v777_v50  ;;  %p3069_p3 = scmp.ne.s32.totalorder %s3815_s29, %s3068_s22 }
  0xa6   : > { %v2882_v40 = vld [vmem:[#allocation8 + $0x20] sm:$0xff]   ;;  %v2885_v43 = vld [vmem:[#allocation8 + $0x38] sm:$0xff]  }
  0xa7   : > { %p3070_p5 = pnand %p3069_p3, %p3384_p10 }
  0xa8   : > { %2647 = vmatpush3.bf16.msra.mxu1 %v2865_v5  ;;  %2627 = vmatpush3.bf16.msra.mxu0 %v2868_v6 }
  0xa9   : > { %2648 = vmatprep.subr.bf16.mxu1 %v3153_v0  ;;  %2628 = vmatprep.subr.bf16.mxu0 %v3153_v0  ;;  %p3071_p7 = pneg %p3070_p5 }
  0xac   : > { %2649 = vmatpush3.bf16.msra.mxu1 %v2867_v7  ;;  %2629 = vmatpush3.bf16.msra.mxu0 %v2870_v8 }
  0xad   : > { %2650 = vmatprep.subr.bf16.mxu1 %v3153_v0  ;;  %2630 = vmatprep.subr.bf16.mxu0 %v3153_v0 }
  0xb0   : > { %2651 = vmatpush3.bf16.msra.mxu1 %v2869_v9  ;;  %2631 = vmatpush3.bf16.msra.mxu0 %v2872_v11 }
  0xb1   : > { %2652 = vmatprep.subr.bf16.mxu1 %v3153_v0  ;;  %2632 = vmatprep.subr.bf16.mxu0 %v3153_v0 }
  0xb4   : > { %2653 = vmatpush3.bf16.msra.mxu1 %v2871_v10  ;;  %2633 = vmatpush3.bf16.msra.mxu0 %v2874_v12 }
  0xb5   : > { %2654 = vmatprep.subr.bf16.mxu1 %v3153_v0  ;;  %2634 = vmatprep.subr.bf16.mxu0 %v3153_v0 }
  0xb8   : > { %2655 = vmatpush3.bf16.msra.mxu1 %v2873_v13  ;;  %2635 = vmatpush3.bf16.msra.mxu0 %v2876_v14 }
  0xb9   : > { %2656 = vmatprep.subr.bf16.mxu1 %v3153_v0  ;;  %2636 = vmatprep.subr.bf16.mxu0 %v3153_v0 }
  0xbc   : > { %2657 = vmatpush3.bf16.msra.mxu1 %v2875_v15  ;;  %2637 = vmatpush3.bf16.msra.mxu0 %v2877_v18 }
  0xbd   : > { %2682 = vmatprep.subr.bf16.mxu1 %v3153_v0  ;;  %2662 = vmatprep.subr.bf16.mxu0 %v3153_v0 }
  0xbf   : > { %2659 = vmatmul.mubr.bf16.vlgmr.msra.gmra.mrb[0].mxu1 %v3477_v19  ;;  %2639 = vmatmul.mubr.bf16.vlgmr.msra.gmra.mrb[0].mxu0 %v3477_v19 }
  0xc0   : > { %2684 = vmatprep.mubr.msk.bf16.mxu1 %vm3154_vm0, %v3153_v0  ;;  %2678 = vmatprep.mubr.msk.bf16.mxu0 %vm3154_vm0, %v3153_v0 }
  0xc1   : > { %2663 = vmatpush3.bf16.msra.mxu0 %v2878_v36 }
  0xc2   : > { %2664 = vmatprep.subr.bf16.mxu0 %v3153_v0 }
  0xc5   : > { %2665 = vmatpush3.bf16.msra.mxu0 %v2879_v37 }
  0xc6   : > { %2666 = vmatprep.subr.bf16.mxu0 %v3153_v0 }
  0xc9   : > { %2667 = vmatpush3.bf16.msra.mxu0 %v2880_v38 }
  0xca   : > { %2668 = vmatprep.subr.bf16.mxu0 %v3153_v0 }
  0xcd   : > { %2669 = vmatpush3.bf16.msra.mxu0 %v2881_v39 }
  0xce   : > { %2670 = vmatprep.subr.bf16.mxu0 %v3153_v0 }
  0xd1   : > { %2671 = vmatpush3.bf16.msra.mxu0 %v2882_v40 }
  0xd2   : > { %2672 = vmatprep.subr.bf16.mxu0 %v3153_v0 }
  0xd5   : > { %2673 = vmatpush3.bf16.msra.mxu0 %v2883_v41 }
  0xd6   : > { %2674 = vmatprep.subr.bf16.mxu0 %v3153_v0 }
  0xd9   : > { %2675 = vmatpush3.bf16.msra.mxu0 %v2884_v42 }
  0xda   : > { %2676 = vmatprep.subr.bf16.mxu0 %v3153_v0 }
  0xdd   : > { %2677 = vmatpush3.bf16.msra.mxu0 %v2885_v43 }
  0xde   : > { %2706 = vmatprep.subr.bf16.mxu0 %v3153_v0 }
  0xe0   : > { %2679 = vmatmul.mubr.bf16.vlgmr.msra.gmra.mrb[4].mxu0 %v3477_v19 }
  0xe1   : > { %2708 = vmatprep.mubr.msk.bf16.mxu0 %vm3154_vm0, %v3153_v0 }
 0x192   : > { %v630_v21 = vpop.f32.mrb[0].mxu1  ;;  %v518_v25 = vpop.f32.mrb[0].mxu0 }
 0x193   : > { %v3491_v22 = vadd.f32 %v2509_v20, %v630_v21  ;;  %v2660_v23 = vpop.f32.mrb[1].mxu1  ;;  %v2640_v27 = vpop.f32.mrb[1].mxu0  ;;  %v519_v32 = vadd.f32 %v2500_v31, %v518_v25 }
 0x194   : > { %v633_v24 = vpop.f32.mrb[2].mxu1  ;;  %v521_v28 = vpop.f32.mrb[2].mxu0 }
 0x195   : > { %1055 = vrot.lane.b32.xlu1 %v3491_v22, %s3155_s21  ;;  %1049 = vrot.lane.b32.xlu0 %v3491_v22, %s3156_s19  ;;  %v2661_v26 = vpop.f32.mrb[3].mxu1  ;;  %v3497_v29 = vadd.f32 %v2509_v20, %v633_v24  ;;  %v2641_v30 = vpop.f32.mrb[3].mxu0  ;;  %v522_v33 = vadd.f32 %v2500_v31, %v521_v28  ;;  %v3510_v34 = vmul.f32 0.17677669, %v519_v32 }
 0x197   : > { %v3512_v35 = vmul.f32 0.17677669, %v522_v33 }
 0x199   : > { %1061 = vrot.lane.b32.xlu0 %v3491_v22, %s3157_s16  ;;  %1057 = vrot.lane.b32.xlu1 %v3497_v29, %s3155_s21 }
 0x19d   : > { %1063 = vrot.lane.b32.xlu1 %v3497_v29, %s3157_s16  ;;  %1051 = vrot.lane.b32.xlu0 %v3497_v29, %s3156_s19 }
 0x1a1   : > { %753 = vrot.lane.b32.xlu0 %v3510_v34, %s3156_s19  ;;  %755 = vrot.lane.b32.xlu1 %v3512_v35, %s3156_s19 }
 0x1a5   : > { %759 = vrot.lane.b32.xlu0 %v3510_v34, %s3155_s21  ;;  %761 = vrot.lane.b32.xlu1 %v3512_v35, %s3155_s21 }
 0x1a9   : > { %765 = vrot.lane.b32.xlu0 %v3510_v34, %s3157_s16  ;;  %767 = vrot.lane.b32.xlu1 %v3512_v35, %s3157_s16 }
 0x207   : > { %v1056_v51 = vpop.permute.xlu1 %1055  ;;  %v1050_v52 = vpop.permute.xlu0 %1049 }
 0x208   : > { %v1067_v55 = vcombine.low %v3491_v22, %v1056_v51  ;;  %v1068_v56 = vcombine.high %v3491_v22, %v1056_v51 }
 0x20a   : > { %v1075_v62 = vrot.slane %v1067_v55, %v3537_v54  ;;  %v1082_v63 = vrot.slane %v1068_v56, %v3537_v54 }
 0x20b   : > { %v1062_v57 = vpop.permute.xlu0 %1061  ;;  %v1058_v58 = vpop.permute.xlu1 %1057 }
 0x20c   : > { %v1083_v59 = vcombine.low %v1050_v52, %v1062_v57  ;;  %v1084_v60 = vcombine.high %v1050_v52, %v1062_v57  ;;  %v1135_v3 = vcombine.low %v3497_v29, %v1058_v58  ;;  %v1136_v4 = vcombine.high %v3497_v29, %v1058_v58 }
 0x20e   : > { %v1091_v1 = vrot.slane %v1083_v59, %v3537_v54  ;;  %v1098_v2 = vrot.slane %v1084_v60, %v3537_v54  ;;  %v1143_v17 = vrot.slane %v1135_v3, %v3537_v54  ;;  %v1150_v18 = vrot.slane %v1136_v4, %v3537_v54 }
 0x20f   : > { %v1064_v5 = vpop.permute.xlu1 %1063  ;;  %v1052_v6 = vpop.permute.xlu0 %1051 }
 0x210   : > { %v1099_v7 = vcombine.low %v1075_v62, %v1091_v1  ;;  %v1100_v8 = vcombine.high %v1075_v62, %v1091_v1  ;;  %v1115_v9 = vcombine.low %v1082_v63, %v1098_v2  ;;  %v1116_v10 = vcombine.high %v1082_v63, %v1098_v2 }
 0x211   : > { %v1151_v11 = vcombine.low %v1052_v6, %v1064_v5  ;;  %v1152_v12 = vcombine.high %v1052_v6, %v1064_v5 }
 0x212   : > { %v1107_v13 = vrot.slane %v1099_v7, %v3541_v61  ;;  %v1114_v14 = vrot.slane %v1100_v8, %v3541_v61  ;;  %v1123_v15 = vrot.slane %v1115_v9, %v3541_v61  ;;  %v1130_v16 = vrot.slane %v1116_v10, %v3541_v61 }
 0x213   : > { %v1159_v19 = vrot.slane %v1151_v11, %v3537_v54  ;;  %v1166_v20 = vrot.slane %v1152_v12, %v3537_v54  ;;  %v754_v21 = vpop.permute.xlu0 %753  ;;  %v756_v22 = vpop.permute.xlu1 %755 }
 0x214   : > { %v1203_v23 = vcombine.low %v1107_v13, %v1114_v14  ;;  %v2531_v24 = vcombine.high %v1107_v13, %v1114_v14  ;;  %v1219_v25 = vcombine.low %v1123_v15, %v1130_v16  ;;  %v2532_v26 = vcombine.high %v1123_v15, %v1130_v16 }
 0x215   : > { %v1167_v27 = vcombine.low %v1143_v17, %v1159_v19  ;;  %v1168_v28 = vcombine.high %v1143_v17, %v1159_v19  ;;  %v1183_v29 = vcombine.low %v1150_v18, %v1166_v20  ;;  %v1184_v30 = vcombine.high %v1150_v18, %v1166_v20 }
 0x216   : > { %v3558_v31 = vrot.slane %v1203_v23, %v3537_v54  ;;  %v3561_v32 = vrot.slane %v2531_v24, %v3537_v54  ;;  %v3564_v33 = vrot.slane %v1219_v25, %v3537_v54  ;;  %v3567_v36 = vrot.slane %v2532_v26, %v3537_v54 }
 0x217   : > { %v1175_v37 = vrot.slane %v1167_v27, %v3541_v61  ;;  %v1182_v38 = vrot.slane %v1168_v28, %v3541_v61  ;;  %v1191_v39 = vrot.slane %v1183_v29, %v3541_v61  ;;  %v1198_v40 = vrot.slane %v1184_v30, %v3541_v61  ;;  %v760_v41 = vpop.permute.xlu0 %759  ;;  %v762_v42 = vpop.permute.xlu1 %761 }
 0x218   : > { %v771_v43 = vcombine.low %v3510_v34, %v760_v41  ;;  %v772_v44 = vcombine.high %v3510_v34, %v760_v41  ;;  %v839_v45 = vcombine.low %v3512_v35, %v762_v42  ;;  %v840_v46 = vcombine.high %v3512_v35, %v762_v42 }
 0x219   : > { %v1271_v47 = vcombine.low %v1175_v37, %v1182_v38  ;;  %v2533_v48 = vcombine.high %v1175_v37, %v1182_v38  ;;  %v1287_v49 = vcombine.low %v1191_v39, %v1198_v40  ;;  %v2534_v50 = vcombine.high %v1191_v39, %v1198_v40 }
 0x21a   : > { %v779_v51 = vrot.slane %v771_v43, %v3537_v54  ;;  %v786_v52 = vrot.slane %v772_v44, %v3537_v54  ;;  %v847_v63 = vrot.slane %v839_v45, %v3537_v54  ;;  %v854_v1 = vrot.slane %v840_v46, %v3537_v54 }
 0x21b   : > { %v3580_v53 = vrot.slane %v1271_v47, %v3537_v54  ;;  %v3583_v55 = vrot.slane %v2533_v48, %v3537_v54  ;;  %v3586_v34 = vrot.slane %v1287_v49, %v3537_v54  ;;  %v3589_v56 = vrot.slane %v2534_v50, %v3537_v54  ;;  %v766_v35 = vpop.permute.xlu0 %765  ;;  %v768_v57 = vpop.permute.xlu1 %767 }
 0x21c   : > { %v787_v58 = vcombine.low %v754_v21, %v766_v35  ;;  %v788_v59 = vcombine.high %v754_v21, %v766_v35  ;;  %v855_v60 = vcombine.low %v756_v22, %v768_v57  ;;  %v856_v62 = vcombine.high %v756_v22, %v768_v57 }
 0x21d   : > { %v1235_v2 = vcombine.low %v3558_v31, %v3561_v32  ;;  %v1251_v3 = vcombine.low %v3564_v33, %v3567_v36  ;;  %v1303_v10 = vcombine.low %v3580_v53, %v3583_v55  ;;  %v1319_v11 = vcombine.low %v3586_v34, %v3589_v56 }
 0x21e   : > { %v795_v4 = vrot.slane %v787_v58, %v3537_v54  ;;  %v802_v5 = vrot.slane %v788_v59, %v3537_v54  ;;  %v863_v6 = vrot.slane %v855_v60, %v3537_v54  ;;  %v870_v7 = vrot.slane %v856_v62, %v3537_v54 }
 0x21f   : > { %v3602_v8 = vrot.slane %v1235_v2, %v3541_v61  ;;  %v1259_v9 = vrot.slane %v1251_v3, %v3541_v61  ;;  %v1327_v35 = vrot.slane %v1319_v11, %v3541_v61  ;;  %v1320_v11 = vcombine.high %v3586_v34, %v3589_v56 }
 0x220   : > { %v803_v12 = vcombine.low %v779_v51, %v795_v4  ;;  %v804_v13 = vcombine.high %v779_v51, %v795_v4  ;;  %v819_v14 = vcombine.low %v786_v52, %v802_v5  ;;  %v820_v15 = vcombine.high %v786_v52, %v802_v5 }
 0x221   : > { %v871_v16 = vcombine.low %v847_v63, %v863_v6  ;;  %v872_v17 = vcombine.high %v847_v63, %v863_v6  ;;  %v887_v18 = vcombine.low %v854_v1, %v870_v7  ;;  %v888_v19 = vcombine.high %v854_v1, %v870_v7 }
 0x222   : > { %v811_v20 = vrot.slane %v803_v12, %v3541_v61  ;;  %v818_v21 = vrot.slane %v804_v13, %v3541_v61  ;;  %v827_v22 = vrot.slane %v819_v14, %v3541_v61  ;;  %v834_v23 = vrot.slane %v820_v15, %v3541_v61 }
 0x223   : > { %v879_v24 = vrot.slane %v871_v16, %v3541_v61  ;;  %v886_v25 = vrot.slane %v872_v17, %v3541_v61  ;;  %v895_v26 = vrot.slane %v887_v18, %v3541_v61  ;;  %v902_v27 = vrot.slane %v888_v19, %v3541_v61 }
 0x224   : > { %v907_v28 = vcombine.low %v811_v20, %v818_v21  ;;  %v2527_v29 = vcombine.high %v811_v20, %v818_v21  ;;  %v923_v30 = vcombine.low %v827_v22, %v834_v23  ;;  %v2528_v37 = vcombine.high %v827_v22, %v834_v23 }
 0x225   : > { %v975_v38 = vcombine.low %v879_v24, %v886_v25  ;;  %v2529_v39 = vcombine.high %v879_v24, %v886_v25  ;;  %v991_v40 = vcombine.low %v895_v26, %v902_v27  ;;  %v2530_v41 = vcombine.high %v895_v26, %v902_v27 }
 0x226   : > { %v914_v42 = vrot.slane %v907_v28, %v3537_v54  ;;  %v922_v43 = vrot.slane %v2527_v29, %v3537_v54  ;;  %v930_v44 = vrot.slane %v923_v30, %v3537_v54  ;;  %v938_v45 = vrot.slane %v2528_v37, %v3537_v54 }
 0x227   : > { %v982_v46 = vrot.slane %v975_v38, %v3537_v54  ;;  %v990_v47 = vrot.slane %v2529_v39, %v3537_v54  ;;  %v998_v48 = vrot.slane %v991_v40, %v3537_v54  ;;  %v1006_v49 = vrot.slane %v2530_v41, %v3537_v54 }
 0x228   : > { %v939_v50 = vcombine.low %v914_v42, %v922_v43  ;;  %v955_v51 = vcombine.low %v930_v44, %v938_v45  ;;  %v1311_v52 = vrot.slane %v1303_v10, %v3541_v61  ;;  %v1267_v1 = vcombine.low %v3602_v8, %v1259_v9 }
 0x229   : > { %v1007_v57 = vcombine.low %v982_v46, %v990_v47  ;;  %v1023_v58 = vcombine.low %v998_v48, %v1006_v49  ;;  %v1304_v10 = vcombine.high %v3580_v53, %v3583_v55  ;;  %v1268_v12 = vcombine.high %v3602_v8, %v1259_v9 }
 0x22a   : > { %v947_v59 = vrot.slane %v939_v50, %v3541_v61  ;;  %v963_v60 = vrot.slane %v955_v51, %v3541_v61  ;;  %v1335_v2 = vcombine.low %v1311_v52, %v1327_v35  ;;  %v1336_v7 = vcombine.high %v1311_v52, %v1327_v35 }
 0x22b   : > { %v1015_v62 = vrot.slane %v1007_v57, %v3541_v61  ;;  %v1031_v63 = vrot.slane %v1023_v58, %v3541_v61  ;;  %v1236_v13 = vcombine.high %v3558_v31, %v3561_v32  ;;  %v1252_v14 = vcombine.high %v3564_v33, %v3567_v36 }
 0x22c   : > { %v1339_v3 = vpack.c.bf16 %v1335_v2, %v1267_v1  ;;  %v971_v4 = vcombine.low %v947_v59, %v963_v60  ;;  %v1340_v16 = vpack.c.bf16 %v1336_v7, %v1268_v12  ;;  %v1318_v17 = vrot.slane %v1304_v10, %v3541_v61 }
 0x22d   : > { %v1039_v5 = vcombine.low %v1015_v62, %v1031_v63  ;;  %v1334_v53 = vrot.slane %v1320_v11, %v3541_v61  ;;  %v1250_v55 = vrot.slane %v1236_v13, %v3541_v61  ;;  %v1266_v34 = vrot.slane %v1252_v14, %v3541_v61  ;;  %v2518_v14 = vld [vmem:[%s3870_s6] ss:$0 sm:$0xff] }
 0x22e   : > { %v1644_v6 = vsel %vm1639_vm1, %v1339_v3, 0  ;;  %v1691_v56 = vsel %vm1639_vm1, %v1340_v16, 0  ;;  %v940_v9 = vcombine.high %v914_v42, %v922_v43  ;;  %v956_v31 = vcombine.high %v930_v44, %v938_v45  ;;  %v742_v43 = vpop.f32.mrb[4].mxu0 }
 0x22f   : > { %2683 = vmatpush3.bf16.xpose.msra.mxu1 %v1644_v6  ;;  %v1043_v15 = vpack.c.bf16 %v1039_v5, %v971_v4  ;;  %v1337_v8 = vcombine.low %v1318_v17, %v1334_v53  ;;  %v1008_v32 = vcombine.high %v982_v46, %v990_v47  ;;  %v1024_v33 = vcombine.high %v998_v48, %v1006_v49  ;;  %v2680_v44 = vpop.f32.mrb[5].mxu0 }
 0x230   : > { %2688 = vmatprep.subr.bf16.mxu1 %v3153_v0  ;;  %v972_v36 = vcombine.high %v947_v59, %v963_v60  ;;  %v1040_v18 = vcombine.high %v1015_v62, %v1031_v63  ;;  %v1269_v19 = vcombine.low %v1250_v55, %v1266_v34  ;;  %v954_v21 = vrot.slane %v940_v9, %v3541_v61  ;;  %v745_v45 = vpop.f32.mrb[6].mxu0 }
 0x231   : > { %v970_v22 = vrot.slane %v956_v31, %v3541_v61  ;;  %v1022_v23 = vrot.slane %v1008_v32, %v3541_v61  ;;  %v1038_v24 = vrot.slane %v1024_v33, %v3541_v61  ;;  %v1338_v27 = vcombine.high %v1318_v17, %v1334_v53  ;;  %v2681_v46 = vpop.f32.mrb[7].mxu0 }
 0x232   : > { %v1341_v20 = vpack.c.bf16 %v1337_v8, %v1269_v19  ;;  %v1044_v25 = vpack.c.bf16 %v1040_v18, %v972_v36  ;;  %v1270_v30 = vcombine.high %v1250_v55, %v1266_v34  ;;  %v3687_v16 = vadd.f32 %v2518_v14, %v745_v45 }
 0x233   : > { %v973_v28 = vcombine.low %v954_v21, %v970_v22  ;;  %v1041_v29 = vcombine.low %v1022_v23, %v1038_v24  ;;  %v974_v40 = vcombine.high %v954_v21, %v970_v22  ;;  %v1042_v41 = vcombine.high %v1022_v23, %v1038_v24 }
 0x234   : > { %v1738_v26 = vsel %vm1639_vm1, %v1341_v20, 0  ;;  %v1342_v37 = vpack.c.bf16 %v1338_v27, %v1270_v30 }
 0x235   : > { %v1045_v38 = vpack.c.bf16 %v1041_v29, %v973_v28  ;;  %v1046_v42 = vpack.c.bf16 %v1042_v41, %v974_v40 }
 0x236   : > { %2685 = vmatmul.mubr.msk.bf16.vlgmr.msra.gmra.mrb[4].mxu1 %vm1639_vm1, %v1043_v15  ;;  %v1785_v39 = vsel %vm1639_vm1, %v1342_v37, 0  ;;  %v3683_v15 = vadd.f32 %v2518_v14, %v742_v43 }
 0x237   : > { %2689 = vmatpush3.bf16.xpose.msra.mxu1 %v1691_v56  ;;  %2690 = vmatprep.mubr.msk.bf16.mxu1 %vm3154_vm0, %v3153_v0 }
 0x238   : > { %2694 = vmatprep.subr.bf16.mxu1 %v3153_v0 }
 0x23e   : > { %2691 = vmatmul.mubr.msk.bf16.vlgmr.msra.gmra.mrb[8].mxu1 %vm1639_vm1, %v1044_v25 }
 0x23f   : > { %2695 = vmatpush3.bf16.xpose.msra.mxu1 %v1738_v26  ;;  %2696 = vmatprep.mubr.msk.bf16.mxu1 %vm3154_vm0, %v3153_v0 }
 0x240   : > { %2700 = vmatprep.subr.bf16.mxu1 %v3153_v0 }
 0x246   : > { %2697 = vmatmul.mubr.msk.bf16.vlgmr.msra.gmra.mrb[12].mxu1 %vm1639_vm1, %v1045_v38 }
 0x247   : > { %2701 = vmatpush3.bf16.xpose.msra.mxu1 %v1785_v39  ;;  %2702 = vmatprep.mubr.msk.bf16.mxu1 %vm3154_vm0, %v3153_v0 }
 0x248   : > { %2712 = vmatprep.subr.bf16.mxu1 %v3153_v0 }
 0x24e   : > { %2703 = vmatmul.mubr.msk.bf16.vlgmr.msra.gmra.mrb[16].mxu1 %vm1639_vm1, %v1046_v42 }
 0x24f   : > { %2714 = vmatprep.mubr.msk.bf16.mxu1 %vm3154_vm0, %v3153_v0 }
 0x309   : > { %v1680_v47 = vpop.f32.mrb[4].mxu1 }
 0x30a   : > { %v2686_v48 = vpop.f32.mrb[5].mxu1  ;;  %v1829_v49 = vsel %vm1828_vm2, %v1680_v47, -inf }
 0x30b   : > { %1830 = vmax.xlane.f32.xlu0 %v1829_v49  ;;  %v1683_v50 = vpop.f32.mrb[6].mxu1 }
 0x30c   : > { %v2687_v51 = vpop.f32.mrb[7].mxu1  ;;  %v1832_v52 = vsel %vm1828_vm2, %v1683_v50, -inf }
 0x30d   : > { %1833 = vmax.xlane.f32.xlu1 %v1832_v52 }
 0x311   : > { %v1727_v35 = vpop.f32.mrb[8].mxu1 }
 0x312   : > { %v2692_v57 = vpop.f32.mrb[9].mxu1  ;;  %v1835_v58 = vsel %vm1828_vm2, %v1727_v35, -inf }
 0x313   : > { %1836 = vmax.xlane.f32.xlu0 %v1835_v58  ;;  %v1730_v59 = vpop.f32.mrb[10].mxu1 }
 0x314   : > { %v2693_v60 = vpop.f32.mrb[11].mxu1  ;;  %v1838_v62 = vsel %vm1828_vm2, %v1730_v59, -inf }
 0x317   : > { %1839 = vmax.xlane.f32.xlu0 %v1838_v62 }
 0x319   : > { %v1774_v63 = vpop.f32.mrb[12].mxu1 }
 0x31a   : > { %v2698_v1 = vpop.f32.mrb[13].mxu1  ;;  %v1841_v2 = vsel %vm1828_vm2, %v1774_v63, -inf }
 0x31b   : > { %1842 = vmax.xlane.f32.xlu1 %v1841_v2  ;;  %v3674_v3 = vpop.f32.mrb[14].mxu1 }
 0x31c   : > { %v2699_v4 = vpop.f32.mrb[15].mxu1  ;;  %v1844_v5 = vsel %vm1828_vm2, %v3674_v3, -inf }
 0x31d   : > { %1845 = vmax.xlane.f32.xlu0 %v1844_v5 }
 0x321   : > { %v1821_v6 = vpop.f32.mrb[16].mxu1 }
 0x322   : > { %v2704_v7 = vpop.f32.mrb[17].mxu1  ;;  %v1847_v10 = vsel %vm1828_vm2, %v1821_v6, -inf }
 0x323   : > { %1848 = vmax.xlane.f32.xlu1 %v1847_v10  ;;  %v1824_v11 = vpop.f32.mrb[18].mxu1 }
 0x324   : > { %v2705_v12 = vpop.f32.mrb[19].mxu1  ;;  %v1850_v13 = vsel %vm1828_vm2, %v1824_v11, -inf }
 0x325   : > { %1851 = vmax.xlane.f32.xlu0 %v1850_v13 }
 0x334   : > { %1345 = vrot.lane.b32.xlu1 %v3683_v15, %s3156_s19 }
 0x338   : > { %1351 = vrot.lane.b32.xlu1 %v3683_v15, %s3155_s21 }
 0x33b   : > { %1347 = vrot.lane.b32.xlu0 %v3687_v16, %s3156_s19  ;;  %s3897_s19 = sld [smem:[#allocation18_spill]] }
 0x33c   : > { %1353 = vrot.lane.b32.xlu1 %v3687_v16, %s3155_s21 }
 0x33f   : > { %1357 = vrot.lane.b32.xlu0 %v3683_v15, %s3157_s16 }
 0x341   : > { %s3820_s24 = scalar_lea.hbm %s3897_s19, %s2566_s15 }
 0x398   : > { %v1831_v17 = vpop.xlane.xlu0 %1830 }
 0x399   : > { %v1853_v53 = vsub.f32 %v1680_v47, %v1831_v17 }
 0x39a   : > { %v1834_v55 = vpop.xlane.xlu1 %1833 }
 0x39b   : > { %v1861_v34 = vmul.f32 1.442695, %v1853_v53  ;;  %v1854_v56 = vsub.f32 %v1683_v50, %v1834_v55 }
 0x39d   : > { %2894 = vpow2.f32 %v1861_v34  ;;  %v1863_v8 = vmul.f32 1.442695, %v1854_v56 }
 0x39f   : > { %2896 = vpow2.f32 %v1863_v8 }
 0x3a0   : > { %v1837_v9 = vpop.xlane.xlu0 %1836 }
 0x3a1   : > { %v1855_v31 = vsub.f32 %v1727_v35, %v1837_v9 }
 0x3a3   : > { %v1865_v32 = vmul.f32 1.442695, %v1855_v31 }
 0x3a4   : > { %v1840_v33 = vpop.xlane.xlu0 %1839 }
 0x3a5   : > { %2898 = vpow2.f32 %v1865_v32  ;;  %v1856_v36 = vsub.f32 %v1730_v59, %v1840_v33 }
 0x3a7   : > { %v3697_v18 = vpop.eup %2894  ;;  %v1867_v19 = vmul.f32 1.442695, %v1856_v36 }
 0x3a8   : > { %v1843_v20 = vpop.xlane.xlu1 %1842  ;;  %v1877_v21 = vsel %vm1828_vm2, %v3697_v18, 0.0 }
 0x3a9   : > { %v3701_v22 = vpop.eup %2896  ;;  %2900 = vpow2.f32 %v1867_v19  ;;  %v1857_v23 = vsub.f32 %v1774_v63, %v1843_v20  ;;  %1878 = vadd.xlane.f32.xlu1 %v1877_v21 }
 0x3aa   : > { %v1880_v24 = vsel %vm1828_vm2, %v3701_v22, 0.0  ;;  %v1846_v26 = vpop.xlane.xlu0 %1845 }
 0x3ab   : > { %v1869_v25 = vmul.f32 1.442695, %v1857_v23  ;;  %1881 = vadd.xlane.f32.xlu0 %v1880_v24  ;;  %v1858_v49 = vsub.f32 %v3674_v3, %v1846_v26 }
 0x3ad   : > { %2902 = vpow2.f32 %v1869_v25  ;;  %v1871_v50 = vmul.f32 1.442695, %v1858_v49 }
 0x3af   : > { %v3705_v27 = vpop.eup %2898 }
 0x3b0   : > { %v1849_v28 = vpop.xlane.xlu1 %1848  ;;  %v1883_v29 = vsel %vm1828_vm2, %v3705_v27, 0.0 }
 0x3b1   : > { %v1859_v30 = vsub.f32 %v1821_v6, %v1849_v28  ;;  %1884 = vadd.xlane.f32.xlu1 %v1883_v29 }
 0x3b2   : > { %v1852_v37 = vpop.xlane.xlu0 %1851 }
 0x3b3   : > { %v3709_v38 = vpop.eup %2900  ;;  %v1873_v39 = vmul.f32 1.442695, %v1859_v30  ;;  %v1860_v40 = vsub.f32 %v1824_v11, %v1852_v37 }
 0x3b4   : > { %v1886_v41 = vsel %vm1828_vm2, %v3709_v38, 0.0  ;;  %v1346_v57 = vpop.permute.xlu1 %1345 }
 0x3b5   : > { %2904 = vpow2.f32 %v1873_v39  ;;  %v1875_v42 = vmul.f32 1.442695, %v1860_v40  ;;  %1887 = vadd.xlane.f32.xlu0 %v1886_v41 }
 0x3b6   : > { %v1348_v35 = vpop.permute.xlu0 %1347 }
 0x3b7   : > { %v3713_v43 = vpop.eup %2902  ;;  %2906 = vpow2.f32 %v1875_v42 }
 0x3b8   : > { %v1889_v44 = vsel %vm1828_vm2, %v3713_v43, 0.0  ;;  %2908 = vpow2.f32 %v1871_v50  ;;  %v1352_v59 = vpop.permute.xlu1 %1351 }
 0x3b9   : > { %1890 = vadd.xlane.f32.xlu0 %v1889_v44  ;;  %v1363_v63 = vcombine.low %v3683_v15, %v1352_v59  ;;  %v1364_v1 = vcombine.high %v3683_v15, %v1352_v59 }
 0x3ba   : > { %v1358_v58 = vpop.permute.xlu0 %1357 }
 0x3bb   : > { %v1379_v60 = vcombine.low %v1346_v57, %v1358_v58  ;;  %v1380_v62 = vcombine.high %v1346_v57, %v1358_v58  ;;  %v1371_v5 = vrot.slane %v1363_v63, %v3537_v54  ;;  %v1378_v6 = vrot.slane %v1364_v1, %v3537_v54 }
 0x3bc   : > { %v1354_v4 = vpop.permute.xlu1 %1353 }
 0x3bd   : > { %v1387_v2 = vrot.slane %v1379_v60, %v3537_v54  ;;  %v1394_v3 = vrot.slane %v1380_v62, %v3537_v54  ;;  %v1431_v56 = vcombine.low %v3687_v16, %v1354_v4  ;;  %v1432_v8 = vcombine.high %v3687_v16, %v1354_v4 }
 0x3bf   : > { %v3717_v45 = vpop.eup %2904  ;;  %v1395_v7 = vcombine.low %v1371_v5, %v1387_v2  ;;  %v1396_v10 = vcombine.high %v1371_v5, %v1387_v2  ;;  %v1411_v11 = vcombine.low %v1378_v6, %v1394_v3  ;;  %v1412_v12 = vcombine.high %v1378_v6, %v1394_v3 }
 0x3c0   : > { %v1895_v46 = vsel %vm1828_vm2, %v3717_v45, 0.0  ;;  %v1439_v23 = vrot.slane %v1431_v56, %v3537_v54  ;;  %v1446_v24 = vrot.slane %v1432_v8, %v3537_v54 }
 0x3c1   : > { %v3721_v47 = vpop.eup %2906  ;;  %1896 = vadd.xlane.f32.xlu0 %v1895_v46  ;;  %v1403_v14 = vrot.slane %v1395_v7, %v3541_v61  ;;  %v1410_v17 = vrot.slane %v1396_v10, %v3541_v61  ;;  %v1419_v15 = vrot.slane %v1411_v11, %v3541_v61  ;;  %v1426_v53 = vrot.slane %v1412_v12, %v3541_v61 }
 0x3c2   : > { %1359 = vrot.lane.b32.xlu1 %v3687_v16, %s3157_s16  ;;  %v1898_v48 = vsel %vm1828_vm2, %v3721_v47, 0.0  ;;  %v3728_v51 = vpop.eup %2908  ;;  %s3072_s16 = sshll.u32 %s3160_s13, 4  ;;  %s3073_s16 = int_to_ptr.vmem [resolvable:$false] %s3072_s16 }
 0x3c3   : > { %v1892_v52 = vsel %vm1828_vm2, %v3728_v51, 0.0  ;;  %v1499_v9 = vcombine.low %v1403_v14, %v1410_v17  ;;  %v2535_v31 = vcombine.high %v1403_v14, %v1410_v17  ;;  %v1515_v32 = vcombine.low %v1419_v15, %v1426_v53  ;;  %s3074_s23 = scalar_lea.vmem %s3073_s16, 512  ;;  %p3075_p12 = scmp.lt.s32.totalorder %s3815_s29, %s3073_s16 }
 0x3c4   : > { %v2536_v33 = vcombine.high %v1419_v15, %v1426_v53  ;;  %p3076_p1 = scmp.lt.s32.totalorder %s3074_s23, %s3068_s22 }
 0x3c5   : > { %1899 = vadd.xlane.f32.xlu0 %v1898_v48  ;;  %v1506_v25 = vrot.slane %v1499_v9, %v3537_v54  ;;  %v1514_v28 = vrot.slane %v2535_v31, %v3537_v54  ;;  %v1522_v29 = vrot.slane %v1515_v32, %v3537_v54 }
 0x3c6   : > { %v1530_v30 = vrot.slane %v2536_v33, %v3537_v54  ;;  %p3077_p2 = por %p3076_p1, %p3075_p12 }
 0x3c7   : > { %v1531_v50 = vcombine.low %v1506_v25, %v1514_v28  ;;  %v1532_v6 = vcombine.high %v1506_v25, %v1514_v28 }
 0x3c8   : > { %v1548_v7 = vcombine.high %v1522_v29, %v1530_v30  ;;  %p3078_p13 = pnand %p3077_p2, %p3071_p7 }
 0x3c9   : > { %v1539_v4 = vrot.slane %v1531_v50, %v3541_v61  ;;  %v1546_v8 = vrot.slane %v1532_v6, %v3541_v61 }
 0x3ca   : > { %v1562_v9 = vrot.slane %v1548_v7, %v3541_v61 }
 0x3cc   : > { %v1565_v28 = vcombine.low %v1546_v8, %v1562_v9 }
 0x3e6   : > { %1893 = vadd.xlane.f32.xlu1 %v1892_v52  ;;  %v1547_v52 = vcombine.low %v1522_v29, %v1530_v30 }
 0x3e8   : > { %v1555_v5 = vrot.slane %v1547_v52, %v3541_v61  ;;  %v2888_v52 = vld [vmem:[#allocation10 + $0x8] sm:$0xff]  }
 0x3ea   : > { %v1563_v56 = vcombine.low %v1539_v4, %v1555_v5  ;;  %v1564_v33 = vcombine.high %v1539_v4, %v1555_v5  ;;  %v2891_v4 = vld [vmem:[#allocation10 + $0x38] sm:$0xff]   ;;  %v2893_v5 = vld [vmem:[#allocation10 + $0x28] sm:$0xff]  }
 0x436   : > { %v1879_v13 = vpop.xlane.xlu1 %1878 }
 0x437   : > { %2910 = vrcp.f32 %v1879_v13 }
 0x438   : > { %v1882_v34 = vpop.xlane.xlu0 %1881 }
 0x439   : > { %2912 = vrcp.f32 %v1882_v34 }
 0x43e   : > { %v1885_v55 = vpop.xlane.xlu1 %1884 }
 0x441   : > { %v2911_v2 = vpop.eup %2910 }
 0x442   : > { %v1360_v36 = vpop.permute.xlu1 %1359  ;;  %v1888_v21 = vpop.xlane.xlu0 %1887 }
 0x443   : > { %v1447_v19 = vcombine.low %v1348_v35, %v1360_v36  ;;  %v1448_v20 = vcombine.high %v1348_v35, %v1360_v36  ;;  %2914 = vrcp.f32 %v1888_v21  ;;  %v2913_v10 = vpop.eup %2912 }
 0x444   : > { %2916 = vrcp.f32 %v1885_v55 }
 0x445   : > { %v1455_v26 = vrot.slane %v1447_v19, %v3537_v54  ;;  %v1462_v16 = vrot.slane %v1448_v20, %v3537_v54  ;;  %v1910_v19 = vmul.f32 %v2913_v10, %v3701_v22 }
 0x446   : > { %v3756_v49 = vpop.xlane.xlu0 %1890 }
 0x447   : > { %v1463_v37 = vcombine.low %v1439_v23, %v1455_v26  ;;  %v1464_v39 = vcombine.high %v1439_v23, %v1455_v26  ;;  %v1479_v40 = vcombine.low %v1446_v24, %v1462_v16  ;;  %v1480_v41 = vcombine.high %v1446_v24, %v1462_v16 }
 0x448   : > { %v1909_v26 = vmul.f32 %v2911_v2, %v3697_v18 }
 0x449   : > { %v1471_v42 = vrot.slane %v1463_v37, %v3541_v61  ;;  %v1478_v44 = vrot.slane %v1464_v39, %v3541_v61  ;;  %v1487_v46 = vrot.slane %v1479_v40, %v3541_v61  ;;  %v1494_v48 = vrot.slane %v1480_v41, %v3541_v61  ;;  %v2887_v40 = vld [vmem:[#allocation10 + $0x10] sm:$0xff]  }
 0x44a   : > { %v1917_v29 = vpack.c.bf16 %v1910_v19, %v1909_v26  ;;  %v2559_v26 = vld [vmem:[%s3872_s8] ss:$0 sm:$0xff] }
 0x44b   : > { %v1567_v35 = vcombine.low %v1471_v42, %v1478_v44  ;;  %v2537_v57 = vcombine.high %v1471_v42, %v1478_v44  ;;  %v1583_v58 = vcombine.low %v1487_v46, %v1494_v48  ;;  %v2538_v59 = vcombine.high %v1487_v46, %v1494_v48  ;;  %v2886_v48 = vld [vmem:[#allocation10] sm:$0xff]  }
 0x44d   : > { %v1574_v60 = vrot.slane %v1567_v35, %v3537_v54  ;;  %v1582_v62 = vrot.slane %v2537_v57, %v3537_v54  ;;  %v1590_v63 = vrot.slane %v1583_v58, %v3537_v54  ;;  %v1598_v1 = vrot.slane %v2538_v59, %v3537_v54  ;;  %v2915_v14 = vpop.eup %2914 }
 0x44e   : > { %v1897_v3 = vpop.xlane.xlu0 %1896  ;;  %v2917_v55 = vpop.eup %2916  ;;  %v1912_v20 = vmul.f32 %v2915_v14, %v3709_v38 }
 0x44f   : > { %v1599_v11 = vcombine.low %v1574_v60, %v1582_v62  ;;  %v1615_v12 = vcombine.low %v1590_v63, %v1598_v1  ;;  %v1600_v13 = vcombine.high %v1574_v60, %v1582_v62  ;;  %v1616_v17 = vcombine.high %v1590_v63, %v1598_v1  ;;  %v2890_v60 = vld [vmem:[#allocation10 + $0x30] sm:$0xff]  }
 0x450   : > { %2918 = vrcp.f32 %v1897_v3  ;;  %v1911_v16 = vmul.f32 %v2917_v55, %v3705_v27  ;;  %v2892_v3 = vld [vmem:[#allocation10 + $0x20] sm:$0xff]  }
 0x451   : > { %v1607_v15 = vrot.slane %v1599_v11, %v3541_v61  ;;  %v1623_v53 = vrot.slane %v1615_v12, %v3541_v61  ;;  %v1614_v54 = vrot.slane %v1600_v13, %v3541_v61  ;;  %v1630_v31 = vrot.slane %v1616_v17, %v3541_v61 }
 0x452   : > { %v1900_v34 = vpop.xlane.xlu0 %1899  ;;  %v1566_v61 = vcombine.high %v1546_v8, %v1562_v9  ;;  %v1918_v30 = vpack.c.bf16 %v1912_v20, %v1911_v16 }
 0x453   : > { %2920 = vrcp.f32 %v1900_v34  ;;  %v1631_v32 = vcombine.low %v1607_v15, %v1623_v53  ;;  %v1632_v36 = vcombine.high %v1607_v15, %v1623_v53  ;;  %v1633_v24 = vcombine.low %v1614_v54, %v1630_v31 }
 0x454   : > { %v1634_v25 = vcombine.high %v1614_v54, %v1630_v31  ;;  %2922 = vrcp.f32 %v3756_v49  ;;  %v2889_v49 = vld [vmem:[#allocation10 + $0x18] sm:$0xff]  }
 0x455   : > { %v1635_v21 = vpack.c.bf16 %v1631_v32, %v1563_v56  ;;  %v1636_v23 = vpack.c.bf16 %v1632_v36, %v1564_v33  ;;  %v1637_v22 = vpack.c.bf16 %v1633_v24, %v1565_v28 }
 0x456   : > { %v1638_v38 = vpack.c.bf16 %v1634_v25, %v1566_v61 }
 0x457   : > { %2707 = vmatpush3.bf16.msra.mxu0 %v1635_v21  ;;  %2713 = vmatpush3.bf16.msra.mxu1 %v1636_v23 }
 0x458   : > { %2718 = vmatprep.subr.bf16.mxu0 %v3153_v0  ;;  %2724 = vmatprep.subr.bf16.mxu1 %v3153_v0 }
 0x45a   : > { %2709 = vmatmul.mubr.msk.bf16.vlgmr.msra.gmra.mrb[8].mxu0 %vm1828_vm2, %v1917_v29  ;;  %2715 = vmatmul.mubr.msk.bf16.vlgmr.msra.gmra.mrb[20].mxu1 %vm1828_vm2, %v1918_v30  ;;  %v2919_v37 = vpop.eup %2918 }
 0x45b   : > { %2719 = vmatpush3.bf16.msra.mxu0 %v1637_v22  ;;  %2725 = vmatpush3.bf16.msra.mxu1 %v1638_v38  ;;  %v1915_v27 = vmul.f32 %v2919_v37, %v3717_v45 }
 0x45c   : > { %2726 = vmatprep.mubr.msk.bf16.mxu1 %vm3154_vm0, %v3153_v0  ;;  %2720 = vmatprep.mubr.msk.bf16.mxu0 %vm3154_vm0, %v3153_v0 }
 0x45d   : > { %v2921_v18 = vpop.eup %2920  ;;  %2730 = vmatprep.subr.bf16.mxu0 %v3153_v0  ;;  %2738 = vmatprep.subr.bf16.mxu1 %v3153_v0 }
 0x45e   : > { %v1916_v39 = vmul.f32 %v2921_v18, %v3721_v47  ;;  %v2923_v44 = vpop.eup %2922 }
 0x45f   : > { %v1913_v45 = vmul.f32 %v2923_v44, %v3713_v43 }
 0x460   : > { %v1920_v41 = vpack.c.bf16 %v1916_v39, %v1915_v27 }
 0x462   : > { %2727 = vmatmul.mubr.msk.bf16.vlgmr.msra.gmra.mrb[24].mxu1 %vm1828_vm2, %v1920_v41 }
 0x463   : > { %2739 = vmatpush3.bf16.msra.mxu1 %v2887_v40  ;;  %2742 = vmatprep.mubr.msk.bf16.mxu1 %vm3154_vm0, %v3153_v0 }
 0x464   : > { %2740 = vmatprep.subr.bf16.mxu1 %v3153_v0 }
 0x467   : > { %2741 = vmatpush3.bf16.msra.mxu1 %v2889_v49 }
 0x468   : > { %2754 = vmatprep.subr.bf16.mxu1 %v3153_v0 }
 0x473   : > { %v1894_v42 = vpop.xlane.xlu1 %1893 }
 0x474   : > { %2924 = vrcp.f32 %v1894_v42 }
 0x47e   : > { %v2925_v46 = vpop.eup %2924 }
 0x47f   : > { %v1914_v47 = vmul.f32 %v2925_v46, %v3728_v51 }
 0x481   : > { %v1919_v50 = vpack.c.bf16 %v1914_v47, %v1913_v45 }
 0x483   : > { %2721 = vmatmul.mubr.msk.bf16.vlgmr.msra.gmra.mrb[12].mxu0 %vm1828_vm2, %v1919_v50 }
 0x484   : > { %2731 = vmatpush3.bf16.msra.mxu0 %v2886_v48  ;;  %2734 = vmatprep.mubr.msk.bf16.mxu0 %vm3154_vm0, %v3153_v0 }
 0x485   : > { %2732 = vmatprep.subr.bf16.mxu0 %v3153_v0 }
 0x488   : > { %2733 = vmatpush3.bf16.msra.mxu0 %v2888_v52 }
 0x489   : > { %2746 = vmatprep.subr.bf16.mxu0 %v3153_v0 }
 0x52d   : > { %v1958_v43 = vpop.f32.mrb[8].mxu0  ;;  %v2002_v51 = vpop.f32.mrb[20].mxu1 }
 0x52e   : > { %v2710_v35 = vpop.f32.mrb[9].mxu0  ;;  %v2716_v57 = vpop.f32.mrb[21].mxu1 }
 0x52f   : > { %v1961_v58 = vpop.f32.mrb[10].mxu0  ;;  %v2005_v59 = vpop.f32.mrb[22].mxu1 }
 0x530   : > { %v2097_v62 = vpack.c.bf16 %v1961_v58, %v1958_v43  ;;  %v2098_v63 = vpack.c.bf16 %v2005_v59, %v2002_v51  ;;  %v2711_v1 = vpop.f32.mrb[11].mxu0  ;;  %v2717_v2 = vpop.f32.mrb[23].mxu1 }
 0x532   : > { %2735 = vmatmul.mubr.msk.bf16.vlgmr.msra.gmra.mrb[16].mxu0 %vm1639_vm1, %v2097_v62  ;;  %2743 = vmatmul.mubr.msk.bf16.vlgmr.msra.gmra.mrb[28].mxu1 %vm1639_vm1, %v2098_v63 }
 0x533   : > { %2755 = vmatpush3.bf16.msra.mxu1 %v2890_v60  ;;  %2758 = vmatprep.mubr.msk.bf16.mxu1 %vm3154_vm0, %v3153_v0 }
 0x534   : > { %2756 = vmatprep.subr.bf16.mxu1 %v3153_v0  ;;  %2747 = vmatpush3.bf16.msra.mxu0 %v2892_v3 }
 0x535   : > { %v2090_v6 = vpop.f32.mrb[24].mxu1  ;;  %2748 = vmatprep.subr.bf16.mxu0 %v3153_v0  ;;  %2750 = vmatprep.mubr.msk.bf16.mxu0 %vm3154_vm0, %v3153_v0 }
 0x536   : > { %v2728_v7 = vpop.f32.mrb[25].mxu1 }
 0x537   : > { %v2093_v10 = vpop.f32.mrb[26].mxu1  ;;  %2757 = vmatpush3.bf16.msra.mxu1 %v2891_v4 }
 0x538   : > { %v2100_v11 = vpack.c.bf16 %v2093_v10, %v2090_v6  ;;  %v2729_v12 = vpop.f32.mrb[27].mxu1  ;;  %2749 = vmatpush3.bf16.msra.mxu0 %v2893_v5 }
 0x53a   : > { %2759 = vmatmul.mubr.msk.bf16.vlgmr.msra.gmra.mrb[32].mxu1 %vm1639_vm1, %v2100_v11 }
 0x556   : > { %v2046_v13 = vpop.f32.mrb[12].mxu0 }
 0x557   : > { %v2722_v14 = vpop.f32.mrb[13].mxu0 }
 0x558   : > { %v2049_v17 = vpop.f32.mrb[14].mxu0 }
 0x559   : > { %v2099_v15 = vpack.c.bf16 %v2049_v17, %v2046_v13  ;;  %v2723_v53 = vpop.f32.mrb[15].mxu0 }
 0x55b   : > { %2751 = vmatmul.mubr.msk.bf16.vlgmr.msra.gmra.mrb[20].mxu0 %vm1639_vm1, %v2099_v15 }
 0x605   : > { %v2166_v54 = vpop.f32.mrb[16].mxu0  ;;  %v2222_v55 = vpop.f32.mrb[28].mxu1 }
 0x606   : > { %v2341_v34 = vadd.f32 %v2222_v55, %v2166_v54  ;;  %v2736_v0 = vpop.f32.mrb[17].mxu0  ;;  %v2744_v56 = vpop.f32.mrb[29].mxu1 }
 0x607   : > { %v2169_v8 = vpop.f32.mrb[18].mxu0  ;;  %v2225_v9 = vpop.f32.mrb[30].mxu1 }
 0x608   : > { %v2344_v31 = vadd.f32 %v2225_v9, %v2169_v8  ;;  %v2737_v32 = vpop.f32.mrb[19].mxu0  ;;  %v2745_v33 = vpop.f32.mrb[31].mxu1 }
 0x60d   : > { %v2334_v36 = vpop.f32.mrb[32].mxu1 }
 0x60e   : > { %v2760_v19 = vpop.f32.mrb[33].mxu1 }
 0x60f   : > { %v2337_v20 = vpop.f32.mrb[34].mxu1 }
 0x610   : > { %v2761_v21 = vpop.f32.mrb[35].mxu1 }
 0x62e   : > { %v2278_v23 = vpop.f32.mrb[20].mxu0 }
 0x62f   : > { %v2342_v24 = vadd.f32 %v2341_v34, %v2278_v23  ;;  %v2752_v25 = vpop.f32.mrb[21].mxu0 }
 0x630   : > { %v2281_v16 = vpop.f32.mrb[22].mxu0 }
 0x631   : > { %v2343_v28 = vadd.f32 %v2342_v24, %v2334_v36  ;;  %v2345_v61 = vadd.f32 %v2344_v31, %v2281_v16  ;;  %v2753_v29 = vpop.f32.mrb[23].mxu0 }
 0x633   : > { %v2354_v30 = vadd.f32 %v2559_v26, %v2343_v28  ;;  %v2346_v22 = vadd.f32 %v2345_v61, %v2337_v20 }
 0x635   : > { %2356 = vst [vmem:[%s408_s26] sm:$0xff] %v2354_v30  ;;  %v2355_v38 = vadd.f32 %v2559_v26, %v2346_v22 }
 0x637   : > { %2357 = vst [vmem:[%s408_s26 + $0x8] sm:$0xff] %v2355_v38 }
 0x638   : > { %3081 = shalt.err (!%p3078_p13)
}
 0x639   : > { %s3082_s20 = scalar_lea.hbm %s3820_s24, 256  ;;  %s3086_s26 = scalar_lea.hbm %s3897_s19, 512 }
 0x63a   : > { %p3083_p9 = scmp.ne.s32.totalorder %s3820_s24, %s3082_s20  ;;  %p3087_p4 = scmp.lt.u32.totalorder %s3820_s24, %s3897_s19 }
 0x63b   : > { %p3088_p8 = scmp.lt.u32.totalorder %s3086_s26, %s3082_s20  ;;  %p3090_p3 = scmp.lt.u32.totalorder %s3082_s20, %s3820_s24 }
 0x63c   : > { %p3084_p0 = pnand %p3083_p9, %p3384_p10 }
 0x63d   : > { %p3089_p6 = por %p3088_p8, %p3087_p4 }
 0x63e   : > { %p3085_p11 = pneg %p3084_p0 }
 0x63f   : > { %p3091_p5 = por %p3090_p3, %p3089_p6 }
 0x641   : > { %p3092_p7 = pnand %p3091_p5, %p3085_p11 }
 0x643   : > { %3095 = shalt.err (!%p3092_p7)
}
 0x644   : > { %s3161_s21 = smov 128   ;;  %s3162_s22 = smov 8  }
 0x645   : > { %2780 = dma.vmem_to_hbm [thread:$0]  (%p3384_p10), %s3815_s29, 256, %s3820_s24, %s2359_s25, %s3161_s21, %s3161_s21, %s3162_s22  }
 0x646 PF: > { %s3898_s13 = sld [smem:[#allocation16_spill]]  ;;  %s3899_s16 = sld [smem:[#allocation17_spill]] }
 0x647   : > { %p3901_p1 = scmp.ge.s32.totalorder %s3142_s12, 2 }
 0x64c   : > { %s2387_s23 = sand.u32 1, %s3898_s13   ;;  %p3900_p12 = scmp.ne.s32.totalorder %s3899_s16, 0 }
 0x64d   : > { %s2388_s20 = scalar_lea.sflag [#allocation4], %s2387_s23 }
 0x64e   : > { %p2800_p2 = pnand %p3901_p1, %p3900_p12 }
 0x650   : > { %3125 = dma.done.wait (!%p2800_p2), %s2388_s20, 256  }
 0x651   : > { %3127 = vsyncadd (!%p2800_p2), %s2388_s20, 4294967040  ;;  %p24_p13 = scmp.ge.s32.totalorder %s3374_s14, 4   ;;  %s3902_s30 = smov %s3134_s10 }
 0x652   : > { %s3903_s10 = smov %s3138_s11  ;;  %s3904_s11 = smov %s3390_s28 }
 0x653   : > { %s3905_s12 = smov %s3374_s14  ;;  %26 = sbr.rel (!%p24_p13) target bundleno = 9 (0x9), region = 117 }
 0x65a   :  { %2393 = vsyncpa [#allocation3], 1 }
 0x65b   :  { %2395 = vsyncpa [#allocation3 + $0x1], 1 }
 0x65c   :  { %2396 = vsyncpa [#allocation6], 1 }
 0x65d   :  { %2397 = vsyncpa [#allocation9], 1 }
 0x65e   :  { %2398 = vsyncpa [#allocation4], 1 }
 0x65f   :  { %2400 = vsyncpa [#allocation4 + $0x1], 1 }

</bundles_post_ra>
